<compile_context>
chip_gen: v5e
topology: v5e:2x2
jax: 0.10.0
libtpu: 0.0.40
codegen_flags: <defaults>
</compile_context>

<pallas_src>
import functools

import jax
import jax.numpy as jnp
from jax.experimental import pallas as pl
from jax.experimental.pallas import tpu as pltpu


def _selection_dot(imgT_ref, wT_ref, idxT_ref, k_base):
    """Build the weighted selection matrix for this voxel chunk and matmul it."""
    imgT = imgT_ref[...]                      # (C, tv) f32 voxel-table chunk
    w = wT_ref[...]                           # (8, tn) f32 deduped corner weights
    idx = idxT_ref[...]                       # (8, tn) i32 flat corner indices
    if not (isinstance(k_base, int) and k_base == 0):
        idx = idx - k_base                    # chunk-local indices (cheap: 8 rows)

    tv = imgT.shape[1]
    tn = idx.shape[1]
    row = jax.lax.broadcasted_iota(jnp.int32, (tv, tn), 0)

    # Overwrite-select: 2 VPU ops per corner on the (tv, tn) tile.  Duplicate
    # corner indices are safe because the wrapper pre-summed their weights, so
    # the last matching corner writes the full sum.
    s = jnp.where(row == idx[0:1, :], w[0:1, :], 0.0)
    for c in range(1, 8):
        s = jnp.where(row == idx[c:c + 1, :], w[c:c + 1, :], s)

    # Single MXU matmul replaces 8 gathers + 7 lerps.
    return jnp.dot(imgT, s, preferred_element_type=jnp.float32)


def _trilerp_kernel_single(imgT_ref, wT_ref, idxT_ref, out_ref):
    # Fast path: whole voxel table resident (constant block index => one fetch);
    # no accumulator scratch, no zero-init, no final copy.
    out_ref[...] = _selection_dot(imgT_ref, wT_ref, idxT_ref, 0).astype(out_ref.dtype)


def _trilerp_kernel_chunked(imgT_ref, wT_ref, idxT_ref, out_ref, acc_ref):
    # Voxel axis chunked with an "arbitrary" reduction grid axis; exact because
    # chunks not containing a corner contribute 0.
    k = pl.program_id(1)
    nk = pl.num_programs(1)
    tv = imgT_ref.shape[1]

    part = _selection_dot(imgT_ref, wT_ref, idxT_ref, k * tv)

    @pl.when(k == 0)
    def _():
        acc_ref[...] = part          # init with first partial dot (no zero-store)

    @pl.when(k > 0)
    def _():
        acc_ref[...] += part

    @pl.when(k == nk - 1)
    def _():
        out_ref[...] = acc_ref[...].astype(out_ref.dtype)


@functools.partial(jax.jit, static_argnames=("tn", "tv"))
def trilinear_interpolate(img, trid, trii, tn=None, tv=None):
    """Pallas equivalent of TrilinearInterpolator.forward -> (N, C)."""
    assert img.ndim == 5 and img.shape[0] == 1, "img must be (1, C, X, Y, Z)"
    _, C, X, Y, Z = img.shape
    V = X * Y * Z

    # (C, V) channel-major table; flat voxel index x*(Y*Z) + y*Z + z is exactly a
    # reshape of the (C, X, Y, Z) tensor -> no data movement.
    imgT = img[0].reshape(C, V).astype(jnp.float32)

    N = trid.shape[0]
    # Query tile: 256 amortizes per-step overhead, but keep >= 2 tiles whenever
    # possible so the "parallel" axis shards across v7x's two TensorCores.
    if tn is None:
        tn = 128 if N <= 256 else 256

    # Default voxel chunk: as large as possible (ideally tv == V, single fetch)
    # while the (tv, tn) selection temporaries + double-buffered img block stay
    # inside a conservative VMEM budget (v7x has only 64 MiB physical).
    if tv is None:
        budget = 16 * 1024 * 1024
        per_tv = 3 * tn * 4 + 2 * C * 4          # s/row/mask temporaries + img 2x-buffer
        cap = max(128, budget // per_tv)
        if V <= cap:
            tv = V
        else:
            tv = 0
            t = 128
            while t <= cap:
                if V % t == 0:
                    tv = t
                t += 128
            if tv == 0:
                tv = V   # no 128-multiple divisor fits the budget; fall back
    # (8,128) tiling constraint on the img BlockSpec last dim.
    assert tv == V or (V % tv == 0 and tv % 128 == 0), \
        "tv must equal V or be a multiple of 128 dividing V"

    Np = pl.cdiv(N, tn) * tn
    if Np != N:
        # Padded queries read voxel 0 with weight 1 (index 0 is always valid)
        # and are sliced off below.
        trid = jnp.pad(trid, ((0, Np - N), (0, 0)))
        trii = jnp.pad(trii, ((0, Np - N), (0, 0)))

    trid = trid.astype(jnp.float32)
    trii = trii.astype(jnp.int32)

    # Trilinear corner weights (exact expansion of the module's nested lerps),
    # corner order [c000, c100, c010, c001, c110, c101, c011, c111].
    xd, yd, zd = trid[:, 0:1], trid[:, 1:2], trid[:, 2:3]
    mx, my, mz = 1.0 - xd, 1.0 - yd, 1.0 - zd
    w = jnp.concatenate([
        mx * my * mz, xd * my * mz, mx * yd * mz, mx * my * zd,
        xd * yd * mz, xd * my * zd, mx * yd * zd, xd * yd * zd], axis=1)  # (Np, 8)

    # Fold duplicate corner indices (clamped / degenerate corners): every corner
    # gets the summed weight of all corners sharing its voxel index, making the
    # in-kernel overwrite-select exact (last matching corner wins with the sum).
    same = (trii[:, :, None] == trii[:, None, :]).astype(jnp.float32)    # (Np,8,8)
    w_eff = jnp.einsum('ncd,nd->nc', same, w)                            # (Np, 8)

    wT = w_eff.T             # (8, Np)  lane-dense along queries
    idxT = trii.T            # (8, Np)

    nk = V // tv
    grid_i = Np // tn
    cparams = pltpu.CompilerParams(
        dimension_semantics=("parallel",) if nk == 1 else ("parallel", "arbitrary"),
        vmem_limit_bytes=48 * 1024 * 1024)

    if nk == 1:
        outT = pl.pallas_call(
            _trilerp_kernel_single,
            out_shape=jax.ShapeDtypeStruct((C, Np), img.dtype),
            grid_spec=pltpu.PrefetchScalarGridSpec(
                num_scalar_prefetch=0,
                grid=(grid_i,),
                in_specs=[
                    pl.BlockSpec((C, V), lambda i: (0, 0)),    # single resident fetch
                    pl.BlockSpec((8, tn), lambda i: (0, i)),   # corner weights
                    pl.BlockSpec((8, tn), lambda i: (0, i)),   # corner indices
                ],
                out_specs=pl.BlockSpec((C, tn), lambda i: (0, i)),
            ),
            compiler_params=cparams,
        )(imgT, wT, idxT)
    else:
        outT = pl.pallas_call(
            _trilerp_kernel_chunked,
            out_shape=jax.ShapeDtypeStruct((C, Np), img.dtype),
            grid_spec=pltpu.PrefetchScalarGridSpec(
                num_scalar_prefetch=0,
                grid=(grid_i, nk),
                in_specs=[
                    pl.BlockSpec((C, tv), lambda i, k: (0, k)),   # voxel-table chunk
                    pl.BlockSpec((8, tn), lambda i, k: (0, i)),   # corner weights
                    pl.BlockSpec((8, tn), lambda i, k: (0, i)),   # corner indices
                ],
                out_specs=pl.BlockSpec((C, tn), lambda i, k: (0, i)),
                scratch_shapes=[pltpu.VMEM((C, tn), jnp.float32)],
            ),
            compiler_params=cparams,
        )(imgT, wT, idxT)

    # Module semantics: (N, C).  The kernel keeps the lane-dense (C, tn) output
    # (unmasked vst); the transpose back is a single cheap XLA op.
    return outT.T[:N]


def _reference(img, trid, trii):
    """Pure-JAX mirror of the PyTorch forward (nested lerps)."""
    _, C, X, Y, Z = img.shape
    img_flat = jnp.transpose(img[0], (1, 2, 3, 0)).reshape(X * Y * Z, C)
    xd = trid[:, 0:1]
    yd = trid[:, 1:2]
    zd = trid[:, 2:3]
    c000 = img_flat[trii[:, 0], :]
    c100 = img_flat[trii[:, 1], :]
    c010 = img_flat[trii[:, 2], :]
    c001 = img_flat[trii[:, 3], :]
    c110 = img_flat[trii[:, 4], :]
    c101 = img_flat[trii[:, 5], :]
    c011 = img_flat[trii[:, 6], :]
    c111 = img_flat[trii[:, 7], :]
    c00 = c000 * (1 - xd) + c100 * xd
    c01 = c001 * (1 - xd) + c101 * xd
    c10 = c010 * (1 - xd) + c110 * xd
    c11 = c011 * (1 - xd) + c111 * xd
    c0 = c00 * (1 - yd) + c10 * yd
    c1 = c01 * (1 - yd) + c11 * yd
    return c0 * (1 - zd) + c1 * zd


if __name__ == "__main__":
    key = jax.random.PRNGKey(0)
    k_img, k_xyz, k_frac = jax.random.split(key, 3)

    # Small shapes: batch=1, C=32 channels, 8x8x8 volume, N=256 query points.
    C, X, Y, Z = 32, 8, 8, 8
    N = 256

    img = jax.random.normal(k_img, (1, C, X, Y, Z), dtype=jnp.float32)

    # Random base voxel coordinates (so that +1 neighbors stay in bounds).
    base = jax.random.randint(k_xyz, (N, 3), minval=0,
                              maxval=jnp.array([X - 1, Y - 1, Z - 1]))
    x0, y0, z0 = base[:, 0], base[:, 1], base[:, 2]
    x1, y1, z1 = x0 + 1, y0 + 1, z0 + 1

    def flat(x, y, z):
        return x * (Y * Z) + y * Z + z

    # Corner order: [c000, c100, c010, c001, c110, c101, c011, c111]
    trii = jnp.stack([
        flat(x0, y0, z0), flat(x1, y0, z0), flat(x0, y1, z0), flat(x0, y0, z1),
        flat(x1, y1, z0), flat(x1, y0, z1), flat(x0, y1, z1), flat(x1, y1, z1),
    ], axis=1).astype(jnp.int32)

    trid = jax.random.uniform(k_frac, (N, 3), dtype=jnp.float32)

    ref = _reference(img, trid, trii)

    # Default (single-chunk fast) path.
    out = jax.block_until_ready(trilinear_interpolate(img, trid, trii))
    assert out.shape == (N, C)
    assert jnp.allclose(out, ref, atol=1e-5, rtol=1e-5)

    # Chunked-accumulation path (exercises the reduction grid axis over V).
    out_chunked = jax.block_until_ready(
        trilinear_interpolate(img, trid, trii, tv=256))
    assert jnp.allclose(out_chunked, ref, atol=1e-5, rtol=1e-5)

    # Duplicate-corner (clamped-border) case: x1 == x0 for half the queries, so
    # 4 of the 8 corner indices collapse onto the other 4 -- exercises the
    # weight-dedup that makes the overwrite-select exact.
    x1c = jnp.where(jnp.arange(N) % 2 == 0, x0, x1)
    trii_dup = jnp.stack([
        flat(x0, y0, z0), flat(x1c, y0, z0), flat(x0, y1, z0), flat(x0, y0, z1),
        flat(x1c, y1, z0), flat(x1c, y0, z1), flat(x0, y1, z1), flat(x1c, y1, z1),
    ], axis=1).astype(jnp.int32)
    ref_dup = _reference(img, trid, trii_dup)
    out_dup = jax.block_until_ready(trilinear_interpolate(img, trid, trii_dup))
    assert jnp.allclose(out_dup, ref_dup, atol=1e-5, rtol=1e-5)

    print("KERNEL_OK")
</pallas_src>

<mosaic_0001>
module attributes {stable_mosaic.version = 11 : i64} {
  func.func @_trilerp_kernel_single(%arg0: i32, %arg1: memref<32x512xf32, #tpu.memory_space<vmem>>, %arg2: memref<8x128xf32, #tpu.memory_space<vmem>>, %arg3: memref<8x128xi32, #tpu.memory_space<vmem>>, %arg4: memref<32x128xf32, #tpu.memory_space<vmem>>) attributes {dimension_semantics = [#tpu.dimension_semantics<parallel>], iteration_bounds = array<i64: 2>, scalar_prefetch = 0 : i64, scratch_operands = 0 : i64, tpu.core_type = #tpu.core_type<tc>, window_params = [{pipeline_mode = #tpu.pipeline_mode<synchronous>, transform_indices = @transform_0, window_bounds = array<i64: 32, 512>}, {transform_indices = @transform_1, window_bounds = array<i64: 8, 128>}, {transform_indices = @transform_2, window_bounds = array<i64: 8, 128>}, {transform_indices = @transform_3, window_bounds = array<i64: 32, 128>}]} {
    %c0 = arith.constant 0 : index
    %c0_0 = arith.constant 0 : index
    %0 = vector.load %arg1[%c0, %c0_0] : memref<32x512xf32, #tpu.memory_space<vmem>>, vector<32x512xf32>
    %c0_1 = arith.constant 0 : index
    %c0_2 = arith.constant 0 : index
    %1 = vector.load %arg2[%c0_1, %c0_2] : memref<8x128xf32, #tpu.memory_space<vmem>>, vector<8x128xf32>
    %c0_3 = arith.constant 0 : index
    %c0_4 = arith.constant 0 : index
    %2 = vector.load %arg3[%c0_3, %c0_4] : memref<8x128xi32, #tpu.memory_space<vmem>>, vector<8x128xi32>
    %3 = tpu.iota {dimensions = array<i32: 0>} : vector<512x128xi32>
    %4 = vector.extract_strided_slice %2 {offsets = [0, 0], sizes = [1, 128], strides = [1, 1]} : vector<8x128xi32> to vector<1x128xi32>
    %5 = vector.broadcast %4 : vector<1x128xi32> to vector<512x128xi32>
    %6 = arith.cmpi eq, %3, %5 : vector<512x128xi32>
    %7 = vector.extract_strided_slice %1 {offsets = [0, 0], sizes = [1, 128], strides = [1, 1]} : vector<8x128xf32> to vector<1x128xf32>
    %cst = arith.constant 0.000000e+00 : f32
    %8 = vector.shape_cast %7 : vector<1x128xf32> to vector<1x128xf32>
    %9 = vector.broadcast %8 : vector<1x128xf32> to vector<512x128xf32>
    %10 = vector.broadcast %cst : f32 to vector<512x128xf32>
    %11 = arith.select %6, %9, %10 : vector<512x128xi1>, vector<512x128xf32>
    %12 = vector.extract_strided_slice %2 {offsets = [1, 0], sizes = [1, 128], strides = [1, 1]} : vector<8x128xi32> to vector<1x128xi32>
    %13 = vector.broadcast %12 : vector<1x128xi32> to vector<512x128xi32>
    %14 = arith.cmpi eq, %3, %13 : vector<512x128xi32>
    %15 = vector.extract_strided_slice %1 {offsets = [1, 0], sizes = [1, 128], strides = [1, 1]} : vector<8x128xf32> to vector<1x128xf32>
    %16 = vector.shape_cast %15 : vector<1x128xf32> to vector<1x128xf32>
    %17 = vector.broadcast %16 : vector<1x128xf32> to vector<512x128xf32>
    %18 = arith.select %14, %17, %11 : vector<512x128xi1>, vector<512x128xf32>
    %19 = vector.extract_strided_slice %2 {offsets = [2, 0], sizes = [1, 128], strides = [1, 1]} : vector<8x128xi32> to vector<1x128xi32>
    %20 = vector.broadcast %19 : vector<1x128xi32> to vector<512x128xi32>
    %21 = arith.cmpi eq, %3, %20 : vector<512x128xi32>
    %22 = vector.extract_strided_slice %1 {offsets = [2, 0], sizes = [1, 128], strides = [1, 1]} : vector<8x128xf32> to vector<1x128xf32>
    %23 = vector.shape_cast %22 : vector<1x128xf32> to vector<1x128xf32>
    %24 = vector.broadcast %23 : vector<1x128xf32> to vector<512x128xf32>
    %25 = arith.select %21, %24, %18 : vector<512x128xi1>, vector<512x128xf32>
    %26 = vector.extract_strided_slice %2 {offsets = [3, 0], sizes = [1, 128], strides = [1, 1]} : vector<8x128xi32> to vector<1x128xi32>
    %27 = vector.broadcast %26 : vector<1x128xi32> to vector<512x128xi32>
    %28 = arith.cmpi eq, %3, %27 : vector<512x128xi32>
    %29 = vector.extract_strided_slice %1 {offsets = [3, 0], sizes = [1, 128], strides = [1, 1]} : vector<8x128xf32> to vector<1x128xf32>
    %30 = vector.shape_cast %29 : vector<1x128xf32> to vector<1x128xf32>
    %31 = vector.broadcast %30 : vector<1x128xf32> to vector<512x128xf32>
    %32 = arith.select %28, %31, %25 : vector<512x128xi1>, vector<512x128xf32>
    %33 = vector.extract_strided_slice %2 {offsets = [4, 0], sizes = [1, 128], strides = [1, 1]} : vector<8x128xi32> to vector<1x128xi32>
    %34 = vector.broadcast %33 : vector<1x128xi32> to vector<512x128xi32>
    %35 = arith.cmpi eq, %3, %34 : vector<512x128xi32>
    %36 = vector.extract_strided_slice %1 {offsets = [4, 0], sizes = [1, 128], strides = [1, 1]} : vector<8x128xf32> to vector<1x128xf32>
    %37 = vector.shape_cast %36 : vector<1x128xf32> to vector<1x128xf32>
    %38 = vector.broadcast %37 : vector<1x128xf32> to vector<512x128xf32>
    %39 = arith.select %35, %38, %32 : vector<512x128xi1>, vector<512x128xf32>
    %40 = vector.extract_strided_slice %2 {offsets = [5, 0], sizes = [1, 128], strides = [1, 1]} : vector<8x128xi32> to vector<1x128xi32>
    %41 = vector.broadcast %40 : vector<1x128xi32> to vector<512x128xi32>
    %42 = arith.cmpi eq, %3, %41 : vector<512x128xi32>
    %43 = vector.extract_strided_slice %1 {offsets = [5, 0], sizes = [1, 128], strides = [1, 1]} : vector<8x128xf32> to vector<1x128xf32>
    %44 = vector.shape_cast %43 : vector<1x128xf32> to vector<1x128xf32>
    %45 = vector.broadcast %44 : vector<1x128xf32> to vector<512x128xf32>
    %46 = arith.select %42, %45, %39 : vector<512x128xi1>, vector<512x128xf32>
    %47 = vector.extract_strided_slice %2 {offsets = [6, 0], sizes = [1, 128], strides = [1, 1]} : vector<8x128xi32> to vector<1x128xi32>
    %48 = vector.broadcast %47 : vector<1x128xi32> to vector<512x128xi32>
    %49 = arith.cmpi eq, %3, %48 : vector<512x128xi32>
    %50 = vector.extract_strided_slice %1 {offsets = [6, 0], sizes = [1, 128], strides = [1, 1]} : vector<8x128xf32> to vector<1x128xf32>
    %51 = vector.shape_cast %50 : vector<1x128xf32> to vector<1x128xf32>
    %52 = vector.broadcast %51 : vector<1x128xf32> to vector<512x128xf32>
    %53 = arith.select %49, %52, %46 : vector<512x128xi1>, vector<512x128xf32>
    %54 = vector.extract_strided_slice %2 {offsets = [7, 0], sizes = [1, 128], strides = [1, 1]} : vector<8x128xi32> to vector<1x128xi32>
    %55 = vector.broadcast %54 : vector<1x128xi32> to vector<512x128xi32>
    %56 = arith.cmpi eq, %3, %55 : vector<512x128xi32>
    %57 = vector.extract_strided_slice %1 {offsets = [7, 0], sizes = [1, 128], strides = [1, 1]} : vector<8x128xf32> to vector<1x128xf32>
    %58 = vector.shape_cast %57 : vector<1x128xf32> to vector<1x128xf32>
    %59 = vector.broadcast %58 : vector<1x128xf32> to vector<512x128xf32>
    %60 = arith.select %56, %59, %53 : vector<512x128xi1>, vector<512x128xf32>
    %cst_5 = arith.constant dense<0.000000e+00> : vector<32x128xf32>
    %61 = tpu.matmul %0, %60, %cst_5 {dimension_numbers = #tpu.dot_dimension_numbers<[1], [0], [0], [1], [0, 0, 1, 1], [], []>} : vector<32x512xf32>, vector<512x128xf32>, vector<32x128xf32> -> vector<32x128xf32>
    %c0_6 = arith.constant 0 : index
    %c0_7 = arith.constant 0 : index
    %62 = vector.load %arg4[%c0_6, %c0_7] : memref<32x128xf32, #tpu.memory_space<vmem>>, vector<32x128xf32>
    tpu.vector_store %arg4[%c0_6, %c0_7], %61 {strides = array<i32>} : memref<32x128xf32, #tpu.memory_space<vmem>>, vector<32x128xf32>,
    return
  }
  func.func @transform_0(%arg0: i32) -> (i32, i32) {
    %c0_i32 = arith.constant 0 : i32
    %c0_i32_0 = arith.constant 0 : i32
    %c0_i32_1 = arith.constant 0 : i32
    return %c0_i32, %c0_i32_0 : i32, i32
  }
  func.func @transform_1(%arg0: i32) -> (i32, i32) {
    %c0_i32 = arith.constant 0 : i32
    %c0_i32_0 = arith.constant 0 : i32
    return %c0_i32, %arg0 : i32, i32
  }
  func.func @transform_2(%arg0: i32) -> (i32, i32) {
    %c0_i32 = arith.constant 0 : i32
    %c0_i32_0 = arith.constant 0 : i32
    return %c0_i32, %arg0 : i32, i32
  }
  func.func @transform_3(%arg0: i32) -> (i32, i32) {
    %c0_i32 = arith.constant 0 : i32
    %c0_i32_0 = arith.constant 0 : i32
    return %c0_i32, %arg0 : i32, i32
  }
}

</mosaic_0001>

<bundles_post_ra>
// kernel: trilinear_interpolate.1
= control target key start
LH: loop header
LB: loop body
LE: loop exit
PB: predicated region body
PF: predicated region fallthrough
CT: control target
= control target key end

     0   :  { %8 = vsyncpa [#allocation3], 0  ;;  %s3425_s0 = inlined_call_operand.vmem [shape: f32[32,512], index: 0, kind: input, shape index: {}]   ;;  %s3426_s1 = inlined_call_operand.vmem [shape: f32[8,256], index: 1, kind: input, shape index: {}]   ;;  %s3427_s2 = inlined_call_operand.vmem [shape: s32[8,256], index: 2, kind: input, shape index: {}]   ;;  %s3428_s3 = inlined_call_operand.hbm [shape: f32[32,256], index: 3, kind: output, shape index: {}]  }
   0x1   :  { %10 = vsyncpa [#allocation3 + $0x1], 0  ;;  %s1655_s12 = smov 0   ;;  %s1657_s13 = smov 0  }
   0x2   :  { %s1659_s14 = smov 0   ;;  %s1661_s15 = smov 0  }
   0x3 LB: > { %s1676_s16 = sadd.s32 4294967295, %s1630_s15   ;;  %s1515_s17 = sadd.s32 4294967294, %s1630_s15   ;;  %s1630_s15 = sphi %s1661_s15, %s3434_s15   ;;  %s1626_s14 = sphi %s1659_s14, %s3433_s14   ;;  %s1622_s13 = sphi %s1657_s13, %s3432_s13   ;;  %s1618_s12 = sphi %s1655_s12, %s3431_s12  }
   0x4   : > { %s1680_s18 = sadd.s32 1, %s1630_s15   ;;  %s96_s19 = sadd.s32 1, %s1626_s14 }
   0x5   : > { %s93_s20 = ssub.s32 %s1630_s15, %s1680_s18  ;;  %p106_p0 = scmp.ne.s32.totalorder %s1626_s14, %s1622_s13 }
   0x6   : > { %p94_p1 = scmp.eq.s32.totalorder %s93_s20, 0  ;;  %p107_p2 = scmp.eq.s32.totalorder %s1676_s16, 1 }
   0x7   : > { %p112_p3 = scmp.ne.s32.totalorder %s1622_s13, %s1618_s12  ;;  %p113_p4 = scmp.eq.s32.totalorder %s1515_s17, 1 }
   0x8   : > { %s1691_s21 = scalar_select %p94_p1, %s1626_s14, %s96_s19  }
   0x9   : > { %p1693_p5 = por %p107_p2, %p106_p0  ;;  %p1697_p6 = por %p113_p4, %p112_p3 }
   0xa   : > { %p1518_p7 = scmp.ge.s32.totalorder %s1630_s15, 1  ;;  %p148_p8 = scmp.lt.s32.totalorder %s1630_s15, 3 }
   0xc   : > { %p149_p9 = pnand %p1518_p7, %p148_p8 }
   0xd   : > { %p175_p10 = scmp.lt.s32.totalorder (!%p149_p9), %s1676_s16, 1  ;;  %s1588_s20 = scalar_lea.hbm (!%p149_p9), %s3428_s3, 64 }
   0xe   : > { %152 = sbr.rel (%p149_p9) target bundleno = 465 (0x1d1), region = 32 }
  0x13   : > { %v201_v0 = vlaneseq  ;;  %s176_s24 = scalar_select %p175_p10, %s1676_s16, 1 }
  0x15   : > { %v1705_v1 = vshrl.u32 %v201_v0, 7  ;;  %s1520_s25 = sshll.u32 %s176_s24, 3 }
  0x16   : > { %s178_s28 = scalar_lea.vmem %s3426_s1, %s1520_s25  ;;  %s182_s4 = scalar_lea.vmem %s3427_s2, %s1520_s25 }
  0x17   : > { %v249_v2 = vadd.s32 376, %v1705_v1  ;;  %v1715_v3 = vadd.s32 368, %v1705_v1  ;;  %v1718_v4 = vadd.s32 504, %v1705_v1  ;;  %v1721_v5 = vadd.s32 120, %v1705_v1  ;;  %v199_v7 = vld [vmem:[%s178_s28] sm:$0xff]  ;;  %s172_s28 = sand.u32 1, %s1622_s13  }
  0x18   : > { %v1724_v6 = vadd.s32 248, %v1705_v1  ;;  %v200_v8 = vld [vmem:[%s182_s4] sm:$0xff]  ;;  %v1727_v9 = vadd.s32 360, %v1705_v1  ;;  %v1730_v10 = vadd.s32 496, %v1705_v1  ;;  %v1733_v11 = vadd.s32 112, %v1705_v1  ;;  %s1519_s29 = sshll.u32 %s172_s28, 5 }
  0x19   : > { %v1736_v12 = vadd.s32 240, %v1705_v1  ;;  %v1738_v13 = vperm.slane %v200_v8, 0  ;;  %v1740_v14 = vperm.slane %v199_v7, 0  ;;  %v1742_v15 = vperm.slane %v200_v8, 1  ;;  %s174_s30 = scalar_lea.vmem [#allocation2], %s1519_s29  ;;  %s1523_s4 = sshll.u32 %s1676_s16, 3 }
  0x1a   : > { %v1744_v16 = vperm.slane %v199_v7, 1  ;;  %v1746_v17 = vperm.slane %v200_v8, 2  ;;  %v1748_v18 = vperm.slane %v199_v7, 2  ;;  %v1750_v19 = vperm.slane %v200_v8, 3  ;;  %s1437_s7 = scalar_lea.hbm %s3428_s3, %s1523_s4  ;;  %s1438_s8 = sshll.u32 %s174_s30, 4  ;;  %s1439_s8 = int_to_ptr.vmem [resolvable:$true] %s1438_s8 }
  0x1b   : > { %v1752_v20 = vperm.slane %v199_v7, 3  ;;  %vm314_vm0 = vcmp.eq.s32.totalorder %v249_v2, %v1738_v13  ;;  %vm444_vm1 = vcmp.eq.s32.totalorder %v249_v2, %v1742_v15  ;;  %v1756_v21 = vperm.slane %v200_v8, 4  ;;  %s1440_s9 = sshll.u32 %s1437_s7, 4  ;;  %s1427_s16 = scalar_lea.sflag [#allocation3], %s172_s28  ;;  %s1441_s9 = int_to_ptr.hbm [resolvable:$true] %s1440_s9 }
  0x1c   : > { %v1758_v22 = vperm.slane %v199_v7, 4  ;;  %v379_v23 = vsel %vm314_vm0, %v1740_v14, 0.0  ;;  %vm574_vm2 = vcmp.eq.s32.totalorder %v249_v2, %v1746_v17  ;;  %vm704_vm3 = vcmp.eq.s32.totalorder %v249_v2, %v1750_v19  ;;  %s1582_s10 = sshra.s32 %s1441_s9, 4  ;;  %s1583_s10 = int_to_ptr.hbm [resolvable:$true] %s1582_s10 }
  0x1d   : > { %v1763_v24 = vperm.slane %v200_v8, 5  ;;  %v509_v25 = vsel %vm444_vm1, %v1744_v16, %v379_v23  ;;  %vm834_vm4 = vcmp.eq.s32.totalorder %v249_v2, %v1756_v21  ;;  %v1767_v26 = vperm.slane %v199_v7, 5  ;;  %s1584_s11 = scalar_lea.hbm %s1583_s10, 32  ;;  %p1589_p0 = scmp.lt.s32.totalorder %s1583_s10, %s3428_s3 }
  0x1e   : > { %v1769_v27 = vperm.slane %v200_v8, 6  ;;  %v639_v28 = vsel %vm574_vm2, %v1748_v18, %v509_v25  ;;  %v1773_v29 = vperm.slane %v199_v7, 6  ;;  %v1775_v30 = vperm.slane %v200_v8, 7  ;;  %p1585_p11 = scmp.ne.s32.totalorder %s1583_s10, %s1584_s11  ;;  %p1590_p1 = scmp.lt.s32.totalorder %s1588_s20, %s1584_s11 }
  0x1f   : > { %vm964_vm5 = vcmp.eq.s32.totalorder %v249_v2, %v1763_v24  ;;  %v769_v31 = vsel %vm704_vm3, %v1752_v20, %v639_v28  ;;  %v1779_v32 = vperm.slane %v199_v7, 7  ;;  %vm313_vm7 = vcmp.eq.s32.totalorder %v1715_v3, %v1738_v13 }
  0x20   : > { %vm1094_vm6 = vcmp.eq.s32.totalorder %v249_v2, %v1769_v27  ;;  %v899_v33 = vsel %vm834_vm4, %v1758_v22, %v769_v31  ;;  %vm1224_vm8 = vcmp.eq.s32.totalorder %v249_v2, %v1775_v30  ;;  %v378_v34 = vsel %vm313_vm7, %v1740_v14, 0.0  ;;  %p1586_p12 = pnand %p1585_p11, %p1693_p5  ;;  %p1591_p2 = por %p1590_p1, %p1589_p0 }
  0x21   : > { %vm443_vm9 = vcmp.eq.s32.totalorder %v1715_v3, %v1742_v15  ;;  %v1029_v35 = vsel %vm964_vm5, %v1767_v26, %v899_v33  ;;  %vm573_vm10 = vcmp.eq.s32.totalorder %v1715_v3, %v1746_v17  ;;  %vm703_vm11 = vcmp.eq.s32.totalorder %v1715_v3, %v1750_v19 }
  0x22   : > { %v508_v36 = vsel %vm443_vm9, %v1744_v16, %v378_v34  ;;  %v1159_v37 = vsel %vm1094_vm6, %v1773_v29, %v1029_v35  ;;  %vm833_vm12 = vcmp.eq.s32.totalorder %v1715_v3, %v1756_v21  ;;  %vm963_vm13 = vcmp.eq.s32.totalorder %v1715_v3, %v1763_v24  ;;  %p1587_p13 = pneg %p1586_p12 }
  0x23   : > { %v638_v38 = vsel %vm573_vm10, %v1748_v18, %v508_v36  ;;  %v1289_v39 = vsel %vm1224_vm8, %v1779_v32, %v1159_v37  ;;  %vm1093_vm14 = vcmp.eq.s32.totalorder %v1715_v3, %v1769_v27  ;;  %vm1223_vm15 = vcmp.eq.s32.totalorder %v1715_v3, %v1775_v30 }
  0x24   : > { %v768_v40 = vsel %vm703_vm11, %v1752_v20, %v638_v38  ;;  %1364 = vmatpush.msra.mxu2 %v1289_v39  ;;  %vm330_vm0 = vcmp.eq.s32.totalorder %v1718_v4, %v1738_v13  ;;  %vm460_vm1 = vcmp.eq.s32.totalorder %v1718_v4, %v1742_v15  ;;  %vm590_vm2 = vcmp.eq.s32.totalorder %v1718_v4, %v1746_v17  ;;  %p1592_p3 = pnand %p1591_p2, %p1587_p13 }
  0x25   : > { %v898_v41 = vsel %vm833_vm12, %v1758_v22, %v768_v40  ;;  %v395_v43 = vsel %vm330_vm0, %v1740_v14, 0.0  ;;  %vm720_vm3 = vcmp.eq.s32.totalorder %v1718_v4, %v1750_v19  ;;  %vm850_vm4 = vcmp.eq.s32.totalorder %v1718_v4, %v1756_v21 }
  0x26   : > { %v1028_v42 = vsel %vm963_vm13, %v1767_v26, %v898_v41  ;;  %v525_v45 = vsel %vm460_vm1, %v1744_v16, %v395_v43  ;;  %vm980_vm5 = vcmp.eq.s32.totalorder %v1718_v4, %v1763_v24  ;;  %vm1110_vm6 = vcmp.eq.s32.totalorder %v1718_v4, %v1769_v27 }
  0x27   : > { %v1158_v44 = vsel %vm1093_vm14, %v1773_v29, %v1028_v42  ;;  %v655_v47 = vsel %vm590_vm2, %v1748_v18, %v525_v45  ;;  %vm1240_vm7 = vcmp.eq.s32.totalorder %v1718_v4, %v1775_v30  ;;  %vm282_vm8 = vcmp.eq.s32.totalorder %v1721_v5, %v1738_v13 }
  0x28   : > { %v1288_v46 = vsel %vm1223_vm15, %v1779_v32, %v1158_v44  ;;  %v785_v48 = vsel %vm720_vm3, %v1752_v20, %v655_v47  ;;  %v347_v49 = vsel %vm282_vm8, %v1740_v14, 0.0  ;;  %vm412_vm9 = vcmp.eq.s32.totalorder %v1721_v5, %v1742_v15 }
  0x29   : > { %1365 = vmatpush.msra.mxu2 %v1288_v46  ;;  %vm542_vm10 = vcmp.eq.s32.totalorder %v1721_v5, %v1746_v17  ;;  %v915_v50 = vsel %vm850_vm4, %v1758_v22, %v785_v48  ;;  %v477_v51 = vsel %vm412_vm9, %v1744_v16, %v347_v49  ;;  %vm672_vm11 = vcmp.eq.s32.totalorder %v1721_v5, %v1750_v19 }
  0x2a   : > { %vm802_vm12 = vcmp.eq.s32.totalorder %v1721_v5, %v1756_v21  ;;  %v1045_v52 = vsel %vm980_vm5, %v1767_v26, %v915_v50  ;;  %v607_v53 = vsel %vm542_vm10, %v1748_v18, %v477_v51  ;;  %vm932_vm13 = vcmp.eq.s32.totalorder %v1721_v5, %v1763_v24 }
  0x2b   : > { %vm1062_vm14 = vcmp.eq.s32.totalorder %v1721_v5, %v1769_v27  ;;  %v1175_v54 = vsel %vm1110_vm6, %v1773_v29, %v1045_v52  ;;  %v737_v55 = vsel %vm672_vm11, %v1752_v20, %v607_v53  ;;  %vm1192_vm15 = vcmp.eq.s32.totalorder %v1721_v5, %v1775_v30 }
  0x2c   : > { %vm298_vm0 = vcmp.eq.s32.totalorder %v1724_v6, %v1738_v13  ;;  %v1305_v56 = vsel %vm1240_vm7, %v1779_v32, %v1175_v54  ;;  %v867_v57 = vsel %vm802_vm12, %v1758_v22, %v737_v55  ;;  %vm428_vm1 = vcmp.eq.s32.totalorder %v1724_v6, %v1742_v15 }
  0x2d   : > { %v363_v58 = vsel %vm298_vm0, %v1740_v14, 0.0  ;;  %1393 = vmatpush.msra.mxu3 %v1305_v56  ;;  %v997_v59 = vsel %vm932_vm13, %v1767_v26, %v867_v57  ;;  %vm558_vm2 = vcmp.eq.s32.totalorder %v1724_v6, %v1746_v17  ;;  %vm688_vm3 = vcmp.eq.s32.totalorder %v1724_v6, %v1750_v19 }
  0x2e   : > { %v493_v60 = vsel %vm428_vm1, %v1744_v16, %v363_v58  ;;  %v1127_v61 = vsel %vm1062_vm14, %v1773_v29, %v997_v59  ;;  %vm818_vm4 = vcmp.eq.s32.totalorder %v1724_v6, %v1756_v21  ;;  %vm948_vm5 = vcmp.eq.s32.totalorder %v1724_v6, %v1763_v24 }
  0x2f   : > { %v623_v62 = vsel %vm558_vm2, %v1748_v18, %v493_v60  ;;  %v1257_v63 = vsel %vm1192_vm15, %v1779_v32, %v1127_v61  ;;  %vm1078_vm6 = vcmp.eq.s32.totalorder %v1724_v6, %v1769_v27  ;;  %vm1208_vm7 = vcmp.eq.s32.totalorder %v1724_v6, %v1775_v30 }
  0x30   : > { %v753_v0 = vsel %vm688_vm3, %v1752_v20, %v623_v62  ;;  %1306 = vmatpush.msra.mxu0 %v1257_v63  ;;  %vm312_vm8 = vcmp.eq.s32.totalorder %v1727_v9, %v1738_v13  ;;  %vm442_vm9 = vcmp.eq.s32.totalorder %v1727_v9, %v1742_v15  ;;  %vm572_vm10 = vcmp.eq.s32.totalorder %v1727_v9, %v1746_v17 }
  0x31   : > { %v883_v2 = vsel %vm818_vm4, %v1758_v22, %v753_v0  ;;  %v377_v4 = vsel %vm312_vm8, %v1740_v14, 0.0  ;;  %vm702_vm11 = vcmp.eq.s32.totalorder %v1727_v9, %v1750_v19  ;;  %vm832_vm12 = vcmp.eq.s32.totalorder %v1727_v9, %v1756_v21 }
  0x32   : > { %v1013_v3 = vsel %vm948_vm5, %v1767_v26, %v883_v2  ;;  %v507_v6 = vsel %vm442_vm9, %v1744_v16, %v377_v4  ;;  %vm962_vm13 = vcmp.eq.s32.totalorder %v1727_v9, %v1763_v24  ;;  %vm1092_vm14 = vcmp.eq.s32.totalorder %v1727_v9, %v1769_v27 }
  0x33   : > { %v1143_v5 = vsel %vm1078_vm6, %v1773_v29, %v1013_v3  ;;  %v637_v8 = vsel %vm572_vm10, %v1748_v18, %v507_v6  ;;  %vm1222_vm15 = vcmp.eq.s32.totalorder %v1727_v9, %v1775_v30  ;;  %vm329_vm0 = vcmp.eq.s32.totalorder %v1730_v10, %v1738_v13 }
  0x34   : > { %v1273_v7 = vsel %vm1208_vm7, %v1779_v32, %v1143_v5  ;;  %v767_v23 = vsel %vm702_vm11, %v1752_v20, %v637_v8  ;;  %v394_v25 = vsel %vm329_vm0, %v1740_v14, 0.0  ;;  %vm459_vm1 = vcmp.eq.s32.totalorder %v1730_v10, %v1742_v15 }
  0x35   : > { %1335 = vmatpush.msra.mxu1 %v1273_v7  ;;  %vm589_vm2 = vcmp.eq.s32.totalorder %v1730_v10, %v1746_v17  ;;  %v897_v28 = vsel %vm832_vm12, %v1758_v22, %v767_v23  ;;  %v524_v31 = vsel %vm459_vm1, %v1744_v16, %v394_v25  ;;  %vm719_vm3 = vcmp.eq.s32.totalorder %v1730_v10, %v1750_v19 }
  0x36   : > { %vm849_vm4 = vcmp.eq.s32.totalorder %v1730_v10, %v1756_v21  ;;  %v1027_v33 = vsel %vm962_vm13, %v1767_v26, %v897_v28  ;;  %v654_v34 = vsel %vm589_vm2, %v1748_v18, %v524_v31  ;;  %vm979_vm5 = vcmp.eq.s32.totalorder %v1730_v10, %v1763_v24 }
  0x37   : > { %vm1109_vm6 = vcmp.eq.s32.totalorder %v1730_v10, %v1769_v27  ;;  %v1157_v35 = vsel %vm1092_vm14, %v1773_v29, %v1027_v33  ;;  %v784_v36 = vsel %vm719_vm3, %v1752_v20, %v654_v34  ;;  %vm1239_vm7 = vcmp.eq.s32.totalorder %v1730_v10, %v1775_v30 }
  0x38   : > { %vm281_vm8 = vcmp.eq.s32.totalorder %v1733_v11, %v1738_v13  ;;  %v1287_v37 = vsel %vm1222_vm15, %v1779_v32, %v1157_v35  ;;  %v914_v38 = vsel %vm849_vm4, %v1758_v22, %v784_v36  ;;  %vm411_vm9 = vcmp.eq.s32.totalorder %v1733_v11, %v1742_v15 }
  0x39   : > { %v346_v39 = vsel %vm281_vm8, %v1740_v14, 0.0  ;;  %1366 = vmatpush.msra.mxu2 %v1287_v37  ;;  %v1044_v40 = vsel %vm979_vm5, %v1767_v26, %v914_v38  ;;  %vm541_vm10 = vcmp.eq.s32.totalorder %v1733_v11, %v1746_v17  ;;  %vm671_vm11 = vcmp.eq.s32.totalorder %v1733_v11, %v1750_v19 }
  0x3a   : > { %v476_v10 = vsel %vm411_vm9, %v1744_v16, %v346_v39  ;;  %v1174_v9 = vsel %vm1109_vm6, %v1773_v29, %v1044_v40  ;;  %vm801_vm12 = vcmp.eq.s32.totalorder %v1733_v11, %v1756_v21  ;;  %vm931_vm13 = vcmp.eq.s32.totalorder %v1733_v11, %v1763_v24 }
  0x3b   : > { %v606_v41 = vsel %vm541_vm10, %v1748_v18, %v476_v10  ;;  %v1304_v42 = vsel %vm1239_vm7, %v1779_v32, %v1174_v9  ;;  %vm1061_vm14 = vcmp.eq.s32.totalorder %v1733_v11, %v1769_v27  ;;  %vm1191_vm15 = vcmp.eq.s32.totalorder %v1733_v11, %v1775_v30 }
  0x3c   : > { %v736_v43 = vsel %vm671_vm11, %v1752_v20, %v606_v41  ;;  %1394 = vmatpush.msra.mxu3 %v1304_v42  ;;  %vm297_vm0 = vcmp.eq.s32.totalorder %v1736_v12, %v1738_v13  ;;  %vm427_vm1 = vcmp.eq.s32.totalorder %v1736_v12, %v1742_v15  ;;  %vm557_vm2 = vcmp.eq.s32.totalorder %v1736_v12, %v1746_v17 }
  0x3d   : > { %v866_v44 = vsel %vm801_vm12, %v1758_v22, %v736_v43  ;;  %v362_v46 = vsel %vm297_vm0, %v1740_v14, 0.0  ;;  %vm687_vm3 = vcmp.eq.s32.totalorder %v1736_v12, %v1750_v19  ;;  %vm817_vm4 = vcmp.eq.s32.totalorder %v1736_v12, %v1756_v21 }
  0x3e   : > { %v996_v45 = vsel %vm931_vm13, %v1767_v26, %v866_v44  ;;  %v492_v47 = vsel %vm427_vm1, %v1744_v16, %v362_v46  ;;  %vm947_vm5 = vcmp.eq.s32.totalorder %v1736_v12, %v1763_v24  ;;  %vm1077_vm6 = vcmp.eq.s32.totalorder %v1736_v12, %v1769_v27 }
  0x3f   : > { %v1126_v11 = vsel %vm1061_vm14, %v1773_v29, %v996_v45  ;;  %v622_v49 = vsel %vm557_vm2, %v1748_v18, %v492_v47  ;;  %vm1207_vm7 = vcmp.eq.s32.totalorder %v1736_v12, %v1775_v30  ;;  %v246_v50 = vadd.s32 352, %v1705_v1 }
  0x40   : > { %v1256_v48 = vsel %vm1191_vm15, %v1779_v32, %v1126_v11  ;;  %v752_v51 = vsel %vm687_vm3, %v1752_v20, %v622_v49  ;;  %v263_v52 = vadd.s32 488, %v1705_v1  ;;  %v1989_v53 = vadd.s32 104, %v1705_v1 }
  0x41   : > { %1307 = vmatpush.msra.mxu0 %v1256_v48  ;;  %v1992_v54 = vadd.s32 232, %v1705_v1  ;;  %v882_v55 = vsel %vm817_vm4, %v1758_v22, %v752_v51  ;;  %vm311_vm8 = vcmp.eq.s32.totalorder %v246_v50, %v1738_v13  ;;  %vm441_vm9 = vcmp.eq.s32.totalorder %v246_v50, %v1742_v15 }
  0x42   : > { %vm571_vm10 = vcmp.eq.s32.totalorder %v246_v50, %v1746_v17  ;;  %v1012_v56 = vsel %vm947_vm5, %v1767_v26, %v882_v55  ;;  %v376_v57 = vsel %vm311_vm8, %v1740_v14, 0.0  ;;  %vm701_vm11 = vcmp.eq.s32.totalorder %v246_v50, %v1750_v19 }
  0x43   : > { %vm831_vm12 = vcmp.eq.s32.totalorder %v246_v50, %v1756_v21  ;;  %v1142_v58 = vsel %vm1077_vm6, %v1773_v29, %v1012_v56  ;;  %v506_v59 = vsel %vm441_vm9, %v1744_v16, %v376_v57  ;;  %vm961_vm13 = vcmp.eq.s32.totalorder %v246_v50, %v1763_v24 }
  0x44   : > { %vm1091_vm14 = vcmp.eq.s32.totalorder %v246_v50, %v1769_v27  ;;  %v1272_v60 = vsel %vm1207_vm7, %v1779_v32, %v1142_v58  ;;  %v636_v61 = vsel %vm571_vm10, %v1748_v18, %v506_v59  ;;  %vm1221_vm15 = vcmp.eq.s32.totalorder %v246_v50, %v1775_v30 }
  0x45   : > { %vm328_vm0 = vcmp.eq.s32.totalorder %v263_v52, %v1738_v13  ;;  %1336 = vmatpush.msra.mxu1 %v1272_v60  ;;  %v766_v62 = vsel %vm701_vm11, %v1752_v20, %v636_v61  ;;  %vm458_vm1 = vcmp.eq.s32.totalorder %v263_v52, %v1742_v15  ;;  %vm588_vm2 = vcmp.eq.s32.totalorder %v263_v52, %v1746_v17 }
  0x46   : > { %v393_v63 = vsel %vm328_vm0, %v1740_v14, 0.0  ;;  %v896_v0 = vsel %vm831_vm12, %v1758_v22, %v766_v62  ;;  %vm718_vm3 = vcmp.eq.s32.totalorder %v263_v52, %v1750_v19  ;;  %vm848_vm4 = vcmp.eq.s32.totalorder %v263_v52, %v1756_v21 }
  0x47   : > { %v523_v12 = vsel %vm458_vm1, %v1744_v16, %v393_v63  ;;  %v1026_v2 = vsel %vm961_vm13, %v1767_v26, %v896_v0  ;;  %vm978_vm5 = vcmp.eq.s32.totalorder %v263_v52, %v1763_v24  ;;  %vm1108_vm6 = vcmp.eq.s32.totalorder %v263_v52, %v1769_v27 }
  0x48   : > { %v653_v3 = vsel %vm588_vm2, %v1748_v18, %v523_v12  ;;  %v1156_v4 = vsel %vm1091_vm14, %v1773_v29, %v1026_v2  ;;  %vm1238_vm7 = vcmp.eq.s32.totalorder %v263_v52, %v1775_v30  ;;  %vm280_vm8 = vcmp.eq.s32.totalorder %v1989_v53, %v1738_v13 }
  0x49   : > { %v783_v5 = vsel %vm718_vm3, %v1752_v20, %v653_v3  ;;  %v1286_v6 = vsel %vm1221_vm15, %v1779_v32, %v1156_v4  ;;  %v345_v8 = vsel %vm280_vm8, %v1740_v14, 0.0  ;;  %vm410_vm9 = vcmp.eq.s32.totalorder %v1989_v53, %v1742_v15 }
  0x4a   : > { %v913_v7 = vsel %vm848_vm4, %v1758_v22, %v783_v5  ;;  %1367 = vmatpush.msra.mxu2 %v1286_v6  ;;  %v475_v25 = vsel %vm410_vm9, %v1744_v16, %v345_v8  ;;  %vm540_vm10 = vcmp.eq.s32.totalorder %v1989_v53, %v1746_v17  ;;  %vm670_vm11 = vcmp.eq.s32.totalorder %v1989_v53, %v1750_v19 }
  0x4b   : > { %v1043_v23 = vsel %vm978_vm5, %v1767_v26, %v913_v7  ;;  %v605_v31 = vsel %vm540_vm10, %v1748_v18, %v475_v25  ;;  %vm800_vm12 = vcmp.eq.s32.totalorder %v1989_v53, %v1756_v21  ;;  %vm930_vm13 = vcmp.eq.s32.totalorder %v1989_v53, %v1763_v24 }
  0x4c   : > { %v1173_v28 = vsel %vm1108_vm6, %v1773_v29, %v1043_v23  ;;  %v735_v34 = vsel %vm670_vm11, %v1752_v20, %v605_v31  ;;  %vm1060_vm14 = vcmp.eq.s32.totalorder %v1989_v53, %v1769_v27  ;;  %vm1190_vm15 = vcmp.eq.s32.totalorder %v1989_v53, %v1775_v30 }
  0x4d   : > { %v1303_v33 = vsel %vm1238_vm7, %v1779_v32, %v1173_v28  ;;  %v865_v35 = vsel %vm800_vm12, %v1758_v22, %v735_v34  ;;  %vm296_vm0 = vcmp.eq.s32.totalorder %v1992_v54, %v1738_v13  ;;  %vm426_vm1 = vcmp.eq.s32.totalorder %v1992_v54, %v1742_v15 }
  0x4e   : > { %1395 = vmatpush.msra.mxu3 %v1303_v33  ;;  %vm556_vm2 = vcmp.eq.s32.totalorder %v1992_v54, %v1746_v17  ;;  %v995_v36 = vsel %vm930_vm13, %v1767_v26, %v865_v35  ;;  %v361_v37 = vsel %vm296_vm0, %v1740_v14, 0.0  ;;  %vm686_vm3 = vcmp.eq.s32.totalorder %v1992_v54, %v1750_v19 }
  0x4f   : > { %vm816_vm4 = vcmp.eq.s32.totalorder %v1992_v54, %v1756_v21  ;;  %v1125_v38 = vsel %vm1060_vm14, %v1773_v29, %v995_v36  ;;  %v491_v39 = vsel %vm426_vm1, %v1744_v16, %v361_v37  ;;  %vm946_vm5 = vcmp.eq.s32.totalorder %v1992_v54, %v1763_v24 }
  0x50   : > { %vm1076_vm6 = vcmp.eq.s32.totalorder %v1992_v54, %v1769_v27  ;;  %v1255_v40 = vsel %vm1190_vm15, %v1779_v32, %v1125_v38  ;;  %v621_v10 = vsel %vm556_vm2, %v1748_v18, %v491_v39  ;;  %vm1206_vm7 = vcmp.eq.s32.totalorder %v1992_v54, %v1775_v30 }
  0x51   : > { %v245_v9 = vadd.s32 344, %v1705_v1  ;;  %1308 = vmatpush.msra.mxu0 %v1255_v40  ;;  %v751_v41 = vsel %vm686_vm3, %v1752_v20, %v621_v10  ;;  %v262_v42 = vadd.s32 480, %v1705_v1  ;;  %v2087_v43 = vadd.s32 96, %v1705_v1 }
  0x52   : > { %v2090_v44 = vadd.s32 224, %v1705_v1  ;;  %v881_v45 = vsel %vm816_vm4, %v1758_v22, %v751_v41  ;;  %v244_v28 = vadd.s32 336, %v1705_v1  ;;  %v261_v33 = vadd.s32 472, %v1705_v1 }
  0x53   : > { %vm310_vm8 = vcmp.eq.s32.totalorder %v245_v9, %v1738_v13  ;;  %vm440_vm9 = vcmp.eq.s32.totalorder %v245_v9, %v1742_v15  ;;  %vm570_vm10 = vcmp.eq.s32.totalorder %v245_v9, %v1746_v17  ;;  %v1011_v46 = vsel %vm946_vm5, %v1767_v26, %v881_v45 }
  0x54   : > { %v375_v11 = vsel %vm310_vm8, %v1740_v14, 0.0  ;;  %vm700_vm11 = vcmp.eq.s32.totalorder %v245_v9, %v1750_v19  ;;  %vm830_vm12 = vcmp.eq.s32.totalorder %v245_v9, %v1756_v21  ;;  %v1141_v47 = vsel %vm1076_vm6, %v1773_v29, %v1011_v46 }
  0x55   : > { %v505_v48 = vsel %vm440_vm9, %v1744_v16, %v375_v11  ;;  %vm960_vm13 = vcmp.eq.s32.totalorder %v245_v9, %v1763_v24  ;;  %vm1090_vm14 = vcmp.eq.s32.totalorder %v245_v9, %v1769_v27  ;;  %v1271_v49 = vsel %vm1206_vm7, %v1779_v32, %v1141_v47 }
  0x56   : > { %v635_v50 = vsel %vm570_vm10, %v1748_v18, %v505_v48  ;;  %vm1220_vm15 = vcmp.eq.s32.totalorder %v245_v9, %v1775_v30  ;;  %vm327_vm0 = vcmp.eq.s32.totalorder %v262_v42, %v1738_v13  ;;  %1337 = vmatpush.msra.mxu1 %v1271_v49  ;;  %vm457_vm1 = vcmp.eq.s32.totalorder %v262_v42, %v1742_v15 }
  0x57   : > { %v765_v51 = vsel %vm700_vm11, %v1752_v20, %v635_v50  ;;  %v392_v52 = vsel %vm327_vm0, %v1740_v14, 0.0  ;;  %vm587_vm2 = vcmp.eq.s32.totalorder %v262_v42, %v1746_v17  ;;  %vm717_vm3 = vcmp.eq.s32.totalorder %v262_v42, %v1750_v19 }
  0x58   : > { %v895_v53 = vsel %vm830_vm12, %v1758_v22, %v765_v51  ;;  %v522_v54 = vsel %vm457_vm1, %v1744_v16, %v392_v52  ;;  %vm847_vm4 = vcmp.eq.s32.totalorder %v262_v42, %v1756_v21  ;;  %vm977_vm5 = vcmp.eq.s32.totalorder %v262_v42, %v1763_v24 }
  0x59   : > { %v1025_v55 = vsel %vm960_vm13, %v1767_v26, %v895_v53  ;;  %v652_v56 = vsel %vm587_vm2, %v1748_v18, %v522_v54  ;;  %vm1107_vm6 = vcmp.eq.s32.totalorder %v262_v42, %v1769_v27  ;;  %vm1237_vm7 = vcmp.eq.s32.totalorder %v262_v42, %v1775_v30 }
  0x5a   : > { %v1155_v57 = vsel %vm1090_vm14, %v1773_v29, %v1025_v55  ;;  %v782_v58 = vsel %vm717_vm3, %v1752_v20, %v652_v56  ;;  %vm279_vm8 = vcmp.eq.s32.totalorder %v2087_v43, %v1738_v13  ;;  %vm409_vm9 = vcmp.eq.s32.totalorder %v2087_v43, %v1742_v15 }
  0x5b   : > { %v1285_v59 = vsel %vm1220_vm15, %v1779_v32, %v1155_v57  ;;  %v912_v60 = vsel %vm847_vm4, %v1758_v22, %v782_v58  ;;  %v344_v61 = vsel %vm279_vm8, %v1740_v14, 0.0  ;;  %vm539_vm10 = vcmp.eq.s32.totalorder %v2087_v43, %v1746_v17 }
  0x5c   : > { %1368 = vmatpush.msra.mxu2 %v1285_v59  ;;  %v1042_v62 = vsel %vm977_vm5, %v1767_v26, %v912_v60  ;;  %v474_v63 = vsel %vm409_vm9, %v1744_v16, %v344_v61  ;;  %vm669_vm11 = vcmp.eq.s32.totalorder %v2087_v43, %v1750_v19  ;;  %vm799_vm12 = vcmp.eq.s32.totalorder %v2087_v43, %v1756_v21 }
  0x5d   : > { %v1172_v0 = vsel %vm1107_vm6, %v1773_v29, %v1042_v62  ;;  %v604_v12 = vsel %vm539_vm10, %v1748_v18, %v474_v63  ;;  %vm929_vm13 = vcmp.eq.s32.totalorder %v2087_v43, %v1763_v24  ;;  %vm1059_vm14 = vcmp.eq.s32.totalorder %v2087_v43, %v1769_v27 }
  0x5e   : > { %v1302_v2 = vsel %vm1237_vm7, %v1779_v32, %v1172_v0  ;;  %v734_v3 = vsel %vm669_vm11, %v1752_v20, %v604_v12  ;;  %vm1189_vm15 = vcmp.eq.s32.totalorder %v2087_v43, %v1775_v30  ;;  %vm295_vm0 = vcmp.eq.s32.totalorder %v2090_v44, %v1738_v13 }
  0x5f   : > { %1396 = vmatpush.msra.mxu3 %v1302_v2  ;;  %v864_v4 = vsel %vm799_vm12, %v1758_v22, %v734_v3  ;;  %vm425_vm1 = vcmp.eq.s32.totalorder %v2090_v44, %v1742_v15  ;;  %vm555_vm2 = vcmp.eq.s32.totalorder %v2090_v44, %v1746_v17  ;;  %v360_v6 = vsel %vm295_vm0, %v1740_v14, 0.0 }
  0x60   : > { %v994_v5 = vsel %vm929_vm13, %v1767_v26, %v864_v4  ;;  %vm685_vm3 = vcmp.eq.s32.totalorder %v2090_v44, %v1750_v19  ;;  %vm815_vm4 = vcmp.eq.s32.totalorder %v2090_v44, %v1756_v21  ;;  %v490_v8 = vsel %vm425_vm1, %v1744_v16, %v360_v6 }
  0x61   : > { %v1124_v7 = vsel %vm1059_vm14, %v1773_v29, %v994_v5  ;;  %vm945_vm5 = vcmp.eq.s32.totalorder %v2090_v44, %v1763_v24  ;;  %vm1075_vm6 = vcmp.eq.s32.totalorder %v2090_v44, %v1769_v27  ;;  %v620_v25 = vsel %vm555_vm2, %v1748_v18, %v490_v8 }
  0x62   : > { %v1254_v23 = vsel %vm1189_vm15, %v1779_v32, %v1124_v7  ;;  %vm1205_vm7 = vcmp.eq.s32.totalorder %v2090_v44, %v1775_v30  ;;  %v750_v31 = vsel %vm685_vm3, %v1752_v20, %v620_v25  ;;  %v2185_v34 = vadd.s32 88, %v1705_v1 }
  0x63   : > { %1309 = vmatpush.msra.mxu0 %v1254_v23  ;;  %v2188_v35 = vadd.s32 216, %v1705_v1  ;;  %v880_v36 = vsel %vm815_vm4, %v1758_v22, %v750_v31  ;;  %vm309_vm8 = vcmp.eq.s32.totalorder %v244_v28, %v1738_v13  ;;  %vm439_vm9 = vcmp.eq.s32.totalorder %v244_v28, %v1742_v15 }
  0x64   : > { %vm569_vm10 = vcmp.eq.s32.totalorder %v244_v28, %v1746_v17  ;;  %v1010_v37 = vsel %vm945_vm5, %v1767_v26, %v880_v36  ;;  %v374_v38 = vsel %vm309_vm8, %v1740_v14, 0.0  ;;  %vm699_vm11 = vcmp.eq.s32.totalorder %v244_v28, %v1750_v19 }
  0x65   : > { %vm829_vm12 = vcmp.eq.s32.totalorder %v244_v28, %v1756_v21  ;;  %v1140_v39 = vsel %vm1075_vm6, %v1773_v29, %v1010_v37  ;;  %v504_v40 = vsel %vm439_vm9, %v1744_v16, %v374_v38  ;;  %vm959_vm13 = vcmp.eq.s32.totalorder %v244_v28, %v1763_v24 }
  0x66   : > { %vm1089_vm14 = vcmp.eq.s32.totalorder %v244_v28, %v1769_v27  ;;  %v1270_v10 = vsel %vm1205_vm7, %v1779_v32, %v1140_v39  ;;  %v634_v9 = vsel %vm569_vm10, %v1748_v18, %v504_v40  ;;  %vm1219_vm15 = vcmp.eq.s32.totalorder %v244_v28, %v1775_v30 }
  0x67   : > { %vm326_vm0 = vcmp.eq.s32.totalorder %v261_v33, %v1738_v13  ;;  %1338 = vmatpush.msra.mxu1 %v1270_v10  ;;  %v764_v41 = vsel %vm699_vm11, %v1752_v20, %v634_v9  ;;  %vm456_vm1 = vcmp.eq.s32.totalorder %v261_v33, %v1742_v15  ;;  %vm586_vm2 = vcmp.eq.s32.totalorder %v261_v33, %v1746_v17 }
  0x68   : > { %v391_v42 = vsel %vm326_vm0, %v1740_v14, 0.0  ;;  %v894_v43 = vsel %vm829_vm12, %v1758_v22, %v764_v41  ;;  %vm716_vm3 = vcmp.eq.s32.totalorder %v261_v33, %v1750_v19  ;;  %vm846_vm4 = vcmp.eq.s32.totalorder %v261_v33, %v1756_v21 }
  0x69   : > { %v521_v44 = vsel %vm456_vm1, %v1744_v16, %v391_v42  ;;  %v1024_v45 = vsel %vm959_vm13, %v1767_v26, %v894_v43  ;;  %vm976_vm5 = vcmp.eq.s32.totalorder %v261_v33, %v1763_v24  ;;  %vm1106_vm6 = vcmp.eq.s32.totalorder %v261_v33, %v1769_v27 }
  0x6a   : > { %v651_v46 = vsel %vm586_vm2, %v1748_v18, %v521_v44  ;;  %v1154_v11 = vsel %vm1089_vm14, %v1773_v29, %v1024_v45  ;;  %vm1236_vm7 = vcmp.eq.s32.totalorder %v261_v33, %v1775_v30  ;;  %vm278_vm8 = vcmp.eq.s32.totalorder %v2185_v34, %v1738_v13 }
  0x6b   : > { %v781_v47 = vsel %vm716_vm3, %v1752_v20, %v651_v46  ;;  %v1284_v48 = vsel %vm1219_vm15, %v1779_v32, %v1154_v11  ;;  %v343_v50 = vsel %vm278_vm8, %v1740_v14, 0.0  ;;  %vm408_vm9 = vcmp.eq.s32.totalorder %v2185_v34, %v1742_v15 }
  0x6c   : > { %v911_v49 = vsel %vm846_vm4, %v1758_v22, %v781_v47  ;;  %1369 = vmatpush.msra.mxu2 %v1284_v48  ;;  %v473_v52 = vsel %vm408_vm9, %v1744_v16, %v343_v50  ;;  %vm538_vm10 = vcmp.eq.s32.totalorder %v2185_v34, %v1746_v17  ;;  %vm668_vm11 = vcmp.eq.s32.totalorder %v2185_v34, %v1750_v19 }
  0x6d   : > { %v1041_v51 = vsel %vm976_vm5, %v1767_v26, %v911_v49  ;;  %v603_v54 = vsel %vm538_vm10, %v1748_v18, %v473_v52  ;;  %vm798_vm12 = vcmp.eq.s32.totalorder %v2185_v34, %v1756_v21  ;;  %vm928_vm13 = vcmp.eq.s32.totalorder %v2185_v34, %v1763_v24 }
  0x6e   : > { %v1171_v53 = vsel %vm1106_vm6, %v1773_v29, %v1041_v51  ;;  %v733_v56 = vsel %vm668_vm11, %v1752_v20, %v603_v54  ;;  %vm1058_vm14 = vcmp.eq.s32.totalorder %v2185_v34, %v1769_v27  ;;  %vm1188_vm15 = vcmp.eq.s32.totalorder %v2185_v34, %v1775_v30 }
  0x6f   : > { %v1301_v55 = vsel %vm1236_vm7, %v1779_v32, %v1171_v53  ;;  %v863_v57 = vsel %vm798_vm12, %v1758_v22, %v733_v56  ;;  %vm294_vm0 = vcmp.eq.s32.totalorder %v2188_v35, %v1738_v13  ;;  %vm424_vm1 = vcmp.eq.s32.totalorder %v2188_v35, %v1742_v15 }
  0x70   : > { %1397 = vmatpush.msra.mxu3 %v1301_v55  ;;  %vm554_vm2 = vcmp.eq.s32.totalorder %v2188_v35, %v1746_v17  ;;  %v993_v58 = vsel %vm928_vm13, %v1767_v26, %v863_v57  ;;  %v359_v59 = vsel %vm294_vm0, %v1740_v14, 0.0  ;;  %vm684_vm3 = vcmp.eq.s32.totalorder %v2188_v35, %v1750_v19 }
  0x71   : > { %vm814_vm4 = vcmp.eq.s32.totalorder %v2188_v35, %v1756_v21  ;;  %v1123_v60 = vsel %vm1058_vm14, %v1773_v29, %v993_v58  ;;  %v489_v61 = vsel %vm424_vm1, %v1744_v16, %v359_v59  ;;  %vm944_vm5 = vcmp.eq.s32.totalorder %v2188_v35, %v1763_v24 }
  0x72   : > { %vm1074_vm6 = vcmp.eq.s32.totalorder %v2188_v35, %v1769_v27  ;;  %v1253_v62 = vsel %vm1188_vm15, %v1779_v32, %v1123_v60  ;;  %v619_v63 = vsel %vm554_vm2, %v1748_v18, %v489_v61  ;;  %vm1204_vm7 = vcmp.eq.s32.totalorder %v2188_v35, %v1775_v30 }
  0x73   : > { %v243_v0 = vadd.s32 328, %v1705_v1  ;;  %1310 = vmatpush.msra.mxu0 %v1253_v62  ;;  %v749_v12 = vsel %vm684_vm3, %v1752_v20, %v619_v63  ;;  %v260_v2 = vadd.s32 464, %v1705_v1  ;;  %v2283_v3 = vadd.s32 80, %v1705_v1 }
  0x74   : > { %v2286_v4 = vadd.s32 208, %v1705_v1  ;;  %v879_v5 = vsel %vm814_vm4, %v1758_v22, %v749_v12  ;;  %v242_v53 = vadd.s32 320, %v1705_v1  ;;  %v259_v55 = vadd.s32 456, %v1705_v1 }
  0x75   : > { %vm308_vm8 = vcmp.eq.s32.totalorder %v243_v0, %v1738_v13  ;;  %vm438_vm9 = vcmp.eq.s32.totalorder %v243_v0, %v1742_v15  ;;  %vm568_vm10 = vcmp.eq.s32.totalorder %v243_v0, %v1746_v17  ;;  %v1009_v6 = vsel %vm944_vm5, %v1767_v26, %v879_v5 }
  0x76   : > { %v373_v7 = vsel %vm308_vm8, %v1740_v14, 0.0  ;;  %vm698_vm11 = vcmp.eq.s32.totalorder %v243_v0, %v1750_v19  ;;  %vm828_vm12 = vcmp.eq.s32.totalorder %v243_v0, %v1756_v21  ;;  %v1139_v8 = vsel %vm1074_vm6, %v1773_v29, %v1009_v6 }
  0x77   : > { %v503_v23 = vsel %vm438_vm9, %v1744_v16, %v373_v7  ;;  %vm958_vm13 = vcmp.eq.s32.totalorder %v243_v0, %v1763_v24  ;;  %vm1088_vm14 = vcmp.eq.s32.totalorder %v243_v0, %v1769_v27  ;;  %v1269_v25 = vsel %vm1204_vm7, %v1779_v32, %v1139_v8 }
  0x78   : > { %v633_v28 = vsel %vm568_vm10, %v1748_v18, %v503_v23  ;;  %vm1218_vm15 = vcmp.eq.s32.totalorder %v243_v0, %v1775_v30  ;;  %vm325_vm0 = vcmp.eq.s32.totalorder %v260_v2, %v1738_v13  ;;  %1339 = vmatpush.msra.mxu1 %v1269_v25  ;;  %vm455_vm1 = vcmp.eq.s32.totalorder %v260_v2, %v1742_v15 }
  0x79   : > { %v763_v31 = vsel %vm698_vm11, %v1752_v20, %v633_v28  ;;  %v390_v33 = vsel %vm325_vm0, %v1740_v14, 0.0  ;;  %vm585_vm2 = vcmp.eq.s32.totalorder %v260_v2, %v1746_v17  ;;  %vm715_vm3 = vcmp.eq.s32.totalorder %v260_v2, %v1750_v19 }
  0x7a   : > { %v893_v34 = vsel %vm828_vm12, %v1758_v22, %v763_v31  ;;  %v520_v35 = vsel %vm455_vm1, %v1744_v16, %v390_v33  ;;  %vm845_vm4 = vcmp.eq.s32.totalorder %v260_v2, %v1756_v21  ;;  %vm975_vm5 = vcmp.eq.s32.totalorder %v260_v2, %v1763_v24 }
  0x7b   : > { %v1023_v36 = vsel %vm958_vm13, %v1767_v26, %v893_v34  ;;  %v650_v37 = vsel %vm585_vm2, %v1748_v18, %v520_v35  ;;  %vm1105_vm6 = vcmp.eq.s32.totalorder %v260_v2, %v1769_v27  ;;  %vm1235_vm7 = vcmp.eq.s32.totalorder %v260_v2, %v1775_v30 }
  0x7c   : > { %v1153_v38 = vsel %vm1088_vm14, %v1773_v29, %v1023_v36  ;;  %v780_v39 = vsel %vm715_vm3, %v1752_v20, %v650_v37  ;;  %vm277_vm8 = vcmp.eq.s32.totalorder %v2283_v3, %v1738_v13  ;;  %vm407_vm9 = vcmp.eq.s32.totalorder %v2283_v3, %v1742_v15 }
  0x7d   : > { %v1283_v40 = vsel %vm1218_vm15, %v1779_v32, %v1153_v38  ;;  %v910_v10 = vsel %vm845_vm4, %v1758_v22, %v780_v39  ;;  %v342_v9 = vsel %vm277_vm8, %v1740_v14, 0.0  ;;  %vm537_vm10 = vcmp.eq.s32.totalorder %v2283_v3, %v1746_v17 }
  0x7e   : > { %1370 = vmatpush.msra.mxu2 %v1283_v40  ;;  %v1040_v41 = vsel %vm975_vm5, %v1767_v26, %v910_v10  ;;  %v472_v42 = vsel %vm407_vm9, %v1744_v16, %v342_v9  ;;  %vm667_vm11 = vcmp.eq.s32.totalorder %v2283_v3, %v1750_v19  ;;  %vm797_vm12 = vcmp.eq.s32.totalorder %v2283_v3, %v1756_v21 }
  0x7f   : > { %v1170_v43 = vsel %vm1105_vm6, %v1773_v29, %v1040_v41  ;;  %v602_v44 = vsel %vm537_vm10, %v1748_v18, %v472_v42  ;;  %vm927_vm13 = vcmp.eq.s32.totalorder %v2283_v3, %v1763_v24  ;;  %vm1057_vm14 = vcmp.eq.s32.totalorder %v2283_v3, %v1769_v27 }
  0x80   : > { %v1300_v45 = vsel %vm1235_vm7, %v1779_v32, %v1170_v43  ;;  %v732_v46 = vsel %vm667_vm11, %v1752_v20, %v602_v44  ;;  %vm1187_vm15 = vcmp.eq.s32.totalorder %v2283_v3, %v1775_v30  ;;  %vm293_vm0 = vcmp.eq.s32.totalorder %v2286_v4, %v1738_v13 }
  0x81   : > { %1398 = vmatpush.msra.mxu3 %v1300_v45  ;;  %v862_v11 = vsel %vm797_vm12, %v1758_v22, %v732_v46  ;;  %vm423_vm1 = vcmp.eq.s32.totalorder %v2286_v4, %v1742_v15  ;;  %vm553_vm2 = vcmp.eq.s32.totalorder %v2286_v4, %v1746_v17  ;;  %v358_v48 = vsel %vm293_vm0, %v1740_v14, 0.0 }
  0x82   : > { %v992_v47 = vsel %vm927_vm13, %v1767_v26, %v862_v11  ;;  %vm683_vm3 = vcmp.eq.s32.totalorder %v2286_v4, %v1750_v19  ;;  %vm813_vm4 = vcmp.eq.s32.totalorder %v2286_v4, %v1756_v21  ;;  %v488_v50 = vsel %vm423_vm1, %v1744_v16, %v358_v48 }
  0x83   : > { %v1122_v49 = vsel %vm1057_vm14, %v1773_v29, %v992_v47  ;;  %vm943_vm5 = vcmp.eq.s32.totalorder %v2286_v4, %v1763_v24  ;;  %vm1073_vm6 = vcmp.eq.s32.totalorder %v2286_v4, %v1769_v27  ;;  %v618_v52 = vsel %vm553_vm2, %v1748_v18, %v488_v50 }
  0x84   : > { %v1252_v51 = vsel %vm1187_vm15, %v1779_v32, %v1122_v49  ;;  %vm1203_vm7 = vcmp.eq.s32.totalorder %v2286_v4, %v1775_v30  ;;  %v748_v54 = vsel %vm683_vm3, %v1752_v20, %v618_v52  ;;  %v2381_v56 = vadd.s32 72, %v1705_v1 }
  0x85   : > { %1311 = vmatpush.msra.mxu0 %v1252_v51  ;;  %v2384_v57 = vadd.s32 200, %v1705_v1  ;;  %v878_v58 = vsel %vm813_vm4, %v1758_v22, %v748_v54  ;;  %vm307_vm8 = vcmp.eq.s32.totalorder %v242_v53, %v1738_v13  ;;  %vm437_vm9 = vcmp.eq.s32.totalorder %v242_v53, %v1742_v15 }
  0x86   : > { %vm567_vm10 = vcmp.eq.s32.totalorder %v242_v53, %v1746_v17  ;;  %v1008_v59 = vsel %vm943_vm5, %v1767_v26, %v878_v58  ;;  %v372_v60 = vsel %vm307_vm8, %v1740_v14, 0.0  ;;  %vm697_vm11 = vcmp.eq.s32.totalorder %v242_v53, %v1750_v19 }
  0x87   : > { %vm827_vm12 = vcmp.eq.s32.totalorder %v242_v53, %v1756_v21  ;;  %v1138_v61 = vsel %vm1073_vm6, %v1773_v29, %v1008_v59  ;;  %v502_v62 = vsel %vm437_vm9, %v1744_v16, %v372_v60  ;;  %vm957_vm13 = vcmp.eq.s32.totalorder %v242_v53, %v1763_v24 }
  0x88   : > { %vm1087_vm14 = vcmp.eq.s32.totalorder %v242_v53, %v1769_v27  ;;  %v1268_v63 = vsel %vm1203_vm7, %v1779_v32, %v1138_v61  ;;  %v632_v0 = vsel %vm567_vm10, %v1748_v18, %v502_v62  ;;  %vm1217_vm15 = vcmp.eq.s32.totalorder %v242_v53, %v1775_v30 }
  0x89   : > { %vm324_vm0 = vcmp.eq.s32.totalorder %v259_v55, %v1738_v13  ;;  %1340 = vmatpush.msra.mxu1 %v1268_v63  ;;  %v762_v12 = vsel %vm697_vm11, %v1752_v20, %v632_v0  ;;  %vm454_vm1 = vcmp.eq.s32.totalorder %v259_v55, %v1742_v15  ;;  %vm584_vm2 = vcmp.eq.s32.totalorder %v259_v55, %v1746_v17 }
  0x8a   : > { %v389_v2 = vsel %vm324_vm0, %v1740_v14, 0.0  ;;  %v892_v3 = vsel %vm827_vm12, %v1758_v22, %v762_v12  ;;  %vm714_vm3 = vcmp.eq.s32.totalorder %v259_v55, %v1750_v19  ;;  %vm844_vm4 = vcmp.eq.s32.totalorder %v259_v55, %v1756_v21 }
  0x8b   : > { %v519_v4 = vsel %vm454_vm1, %v1744_v16, %v389_v2  ;;  %v1022_v5 = vsel %vm957_vm13, %v1767_v26, %v892_v3  ;;  %vm974_vm5 = vcmp.eq.s32.totalorder %v259_v55, %v1763_v24  ;;  %vm1104_vm6 = vcmp.eq.s32.totalorder %v259_v55, %v1769_v27 }
  0x8c   : > { %v649_v6 = vsel %vm584_vm2, %v1748_v18, %v519_v4  ;;  %v1152_v7 = vsel %vm1087_vm14, %v1773_v29, %v1022_v5  ;;  %vm1234_vm7 = vcmp.eq.s32.totalorder %v259_v55, %v1775_v30  ;;  %vm276_vm8 = vcmp.eq.s32.totalorder %v2381_v56, %v1738_v13 }
  0x8d   : > { %v779_v8 = vsel %vm714_vm3, %v1752_v20, %v649_v6  ;;  %v1282_v23 = vsel %vm1217_vm15, %v1779_v32, %v1152_v7  ;;  %v341_v28 = vsel %vm276_vm8, %v1740_v14, 0.0  ;;  %vm406_vm9 = vcmp.eq.s32.totalorder %v2381_v56, %v1742_v15 }
  0x8e   : > { %v909_v25 = vsel %vm844_vm4, %v1758_v22, %v779_v8  ;;  %1371 = vmatpush.msra.mxu2 %v1282_v23  ;;  %v471_v33 = vsel %vm406_vm9, %v1744_v16, %v341_v28  ;;  %vm536_vm10 = vcmp.eq.s32.totalorder %v2381_v56, %v1746_v17  ;;  %vm666_vm11 = vcmp.eq.s32.totalorder %v2381_v56, %v1750_v19 }
  0x8f   : > { %v1039_v31 = vsel %vm974_vm5, %v1767_v26, %v909_v25  ;;  %v601_v35 = vsel %vm536_vm10, %v1748_v18, %v471_v33  ;;  %vm796_vm12 = vcmp.eq.s32.totalorder %v2381_v56, %v1756_v21  ;;  %vm926_vm13 = vcmp.eq.s32.totalorder %v2381_v56, %v1763_v24 }
  0x90   : > { %v1169_v34 = vsel %vm1104_vm6, %v1773_v29, %v1039_v31  ;;  %v731_v37 = vsel %vm666_vm11, %v1752_v20, %v601_v35  ;;  %vm1056_vm14 = vcmp.eq.s32.totalorder %v2381_v56, %v1769_v27  ;;  %vm1186_vm15 = vcmp.eq.s32.totalorder %v2381_v56, %v1775_v30 }
  0x91   : > { %v1299_v36 = vsel %vm1234_vm7, %v1779_v32, %v1169_v34  ;;  %v861_v38 = vsel %vm796_vm12, %v1758_v22, %v731_v37  ;;  %vm292_vm0 = vcmp.eq.s32.totalorder %v2384_v57, %v1738_v13  ;;  %vm422_vm1 = vcmp.eq.s32.totalorder %v2384_v57, %v1742_v15 }
  0x92   : > { %1399 = vmatpush.msra.mxu3 %v1299_v36  ;;  %vm552_vm2 = vcmp.eq.s32.totalorder %v2384_v57, %v1746_v17  ;;  %v991_v39 = vsel %vm926_vm13, %v1767_v26, %v861_v38  ;;  %v357_v40 = vsel %vm292_vm0, %v1740_v14, 0.0  ;;  %vm682_vm3 = vcmp.eq.s32.totalorder %v2384_v57, %v1750_v19 }
  0x93   : > { %vm812_vm4 = vcmp.eq.s32.totalorder %v2384_v57, %v1756_v21  ;;  %v1121_v10 = vsel %vm1056_vm14, %v1773_v29, %v991_v39  ;;  %v487_v9 = vsel %vm422_vm1, %v1744_v16, %v357_v40  ;;  %vm942_vm5 = vcmp.eq.s32.totalorder %v2384_v57, %v1763_v24 }
  0x94   : > { %vm1072_vm6 = vcmp.eq.s32.totalorder %v2384_v57, %v1769_v27  ;;  %v1251_v41 = vsel %vm1186_vm15, %v1779_v32, %v1121_v10  ;;  %v617_v42 = vsel %vm552_vm2, %v1748_v18, %v487_v9  ;;  %vm1202_vm7 = vcmp.eq.s32.totalorder %v2384_v57, %v1775_v30 }
  0x95   : > { %v241_v43 = vadd.s32 312, %v1705_v1  ;;  %1312 = vmatpush.msra.mxu0 %v1251_v41  ;;  %v747_v44 = vsel %vm682_vm3, %v1752_v20, %v617_v42  ;;  %v258_v45 = vadd.s32 448, %v1705_v1  ;;  %v2479_v46 = vadd.s32 64, %v1705_v1 }
  0x96   : > { %v2482_v11 = vadd.s32 192, %v1705_v1  ;;  %v877_v47 = vsel %vm812_vm4, %v1758_v22, %v747_v44  ;;  %v240_v34 = vadd.s32 304, %v1705_v1  ;;  %v257_v36 = vadd.s32 440, %v1705_v1 }
  0x97   : > { %vm306_vm8 = vcmp.eq.s32.totalorder %v241_v43, %v1738_v13  ;;  %vm436_vm9 = vcmp.eq.s32.totalorder %v241_v43, %v1742_v15  ;;  %vm566_vm10 = vcmp.eq.s32.totalorder %v241_v43, %v1746_v17  ;;  %v1007_v48 = vsel %vm942_vm5, %v1767_v26, %v877_v47 }
  0x98   : > { %v371_v49 = vsel %vm306_vm8, %v1740_v14, 0.0  ;;  %vm696_vm11 = vcmp.eq.s32.totalorder %v241_v43, %v1750_v19  ;;  %vm826_vm12 = vcmp.eq.s32.totalorder %v241_v43, %v1756_v21  ;;  %v1137_v50 = vsel %vm1072_vm6, %v1773_v29, %v1007_v48 }
  0x99   : > { %v501_v51 = vsel %vm436_vm9, %v1744_v16, %v371_v49  ;;  %vm956_vm13 = vcmp.eq.s32.totalorder %v241_v43, %v1763_v24  ;;  %vm1086_vm14 = vcmp.eq.s32.totalorder %v241_v43, %v1769_v27  ;;  %v1267_v52 = vsel %vm1202_vm7, %v1779_v32, %v1137_v50 }
  0x9a   : > { %v631_v53 = vsel %vm566_vm10, %v1748_v18, %v501_v51  ;;  %vm1216_vm15 = vcmp.eq.s32.totalorder %v241_v43, %v1775_v30  ;;  %vm323_vm0 = vcmp.eq.s32.totalorder %v258_v45, %v1738_v13  ;;  %1341 = vmatpush.msra.mxu1 %v1267_v52  ;;  %vm453_vm1 = vcmp.eq.s32.totalorder %v258_v45, %v1742_v15 }
  0x9b   : > { %v761_v54 = vsel %vm696_vm11, %v1752_v20, %v631_v53  ;;  %v388_v55 = vsel %vm323_vm0, %v1740_v14, 0.0  ;;  %vm583_vm2 = vcmp.eq.s32.totalorder %v258_v45, %v1746_v17  ;;  %vm713_vm3 = vcmp.eq.s32.totalorder %v258_v45, %v1750_v19 }
  0x9c   : > { %v891_v56 = vsel %vm826_vm12, %v1758_v22, %v761_v54  ;;  %v518_v57 = vsel %vm453_vm1, %v1744_v16, %v388_v55  ;;  %vm843_vm4 = vcmp.eq.s32.totalorder %v258_v45, %v1756_v21  ;;  %vm973_vm5 = vcmp.eq.s32.totalorder %v258_v45, %v1763_v24 }
  0x9d   : > { %v1021_v58 = vsel %vm956_vm13, %v1767_v26, %v891_v56  ;;  %v648_v59 = vsel %vm583_vm2, %v1748_v18, %v518_v57  ;;  %vm1103_vm6 = vcmp.eq.s32.totalorder %v258_v45, %v1769_v27  ;;  %vm1233_vm7 = vcmp.eq.s32.totalorder %v258_v45, %v1775_v30 }
  0x9e   : > { %v1151_v60 = vsel %vm1086_vm14, %v1773_v29, %v1021_v58  ;;  %v778_v61 = vsel %vm713_vm3, %v1752_v20, %v648_v59  ;;  %vm275_vm8 = vcmp.eq.s32.totalorder %v2479_v46, %v1738_v13  ;;  %vm405_vm9 = vcmp.eq.s32.totalorder %v2479_v46, %v1742_v15 }
  0x9f   : > { %v1281_v62 = vsel %vm1216_vm15, %v1779_v32, %v1151_v60  ;;  %v908_v63 = vsel %vm843_vm4, %v1758_v22, %v778_v61  ;;  %v340_v0 = vsel %vm275_vm8, %v1740_v14, 0.0  ;;  %vm535_vm10 = vcmp.eq.s32.totalorder %v2479_v46, %v1746_v17 }
  0xa0   : > { %1372 = vmatpush.msra.mxu2 %v1281_v62  ;;  %v1038_v12 = vsel %vm973_vm5, %v1767_v26, %v908_v63  ;;  %v470_v2 = vsel %vm405_vm9, %v1744_v16, %v340_v0  ;;  %vm665_vm11 = vcmp.eq.s32.totalorder %v2479_v46, %v1750_v19  ;;  %vm795_vm12 = vcmp.eq.s32.totalorder %v2479_v46, %v1756_v21 }
  0xa1   : > { %v1168_v3 = vsel %vm1103_vm6, %v1773_v29, %v1038_v12  ;;  %v600_v4 = vsel %vm535_vm10, %v1748_v18, %v470_v2  ;;  %vm925_vm13 = vcmp.eq.s32.totalorder %v2479_v46, %v1763_v24  ;;  %vm1055_vm14 = vcmp.eq.s32.totalorder %v2479_v46, %v1769_v27 }
  0xa2   : > { %v1298_v5 = vsel %vm1233_vm7, %v1779_v32, %v1168_v3  ;;  %v730_v6 = vsel %vm665_vm11, %v1752_v20, %v600_v4  ;;  %vm1185_vm15 = vcmp.eq.s32.totalorder %v2479_v46, %v1775_v30  ;;  %vm291_vm0 = vcmp.eq.s32.totalorder %v2482_v11, %v1738_v13 }
  0xa3   : > { %1400 = vmatpush.msra.mxu3 %v1298_v5  ;;  %v860_v7 = vsel %vm795_vm12, %v1758_v22, %v730_v6  ;;  %vm421_vm1 = vcmp.eq.s32.totalorder %v2482_v11, %v1742_v15  ;;  %vm551_vm2 = vcmp.eq.s32.totalorder %v2482_v11, %v1746_v17  ;;  %v356_v23 = vsel %vm291_vm0, %v1740_v14, 0.0 }
  0xa4   : > { %v990_v8 = vsel %vm925_vm13, %v1767_v26, %v860_v7  ;;  %vm681_vm3 = vcmp.eq.s32.totalorder %v2482_v11, %v1750_v19  ;;  %vm811_vm4 = vcmp.eq.s32.totalorder %v2482_v11, %v1756_v21  ;;  %v486_v28 = vsel %vm421_vm1, %v1744_v16, %v356_v23 }
  0xa5   : > { %v1120_v25 = vsel %vm1055_vm14, %v1773_v29, %v990_v8  ;;  %vm941_vm5 = vcmp.eq.s32.totalorder %v2482_v11, %v1763_v24  ;;  %vm1071_vm6 = vcmp.eq.s32.totalorder %v2482_v11, %v1769_v27  ;;  %v616_v33 = vsel %vm551_vm2, %v1748_v18, %v486_v28 }
  0xa6   : > { %v1250_v31 = vsel %vm1185_vm15, %v1779_v32, %v1120_v25  ;;  %vm1201_vm7 = vcmp.eq.s32.totalorder %v2482_v11, %v1775_v30  ;;  %v746_v35 = vsel %vm681_vm3, %v1752_v20, %v616_v33  ;;  %v2577_v37 = vadd.s32 56, %v1705_v1 }
  0xa7   : > { %1313 = vmatpush.msra.mxu0 %v1250_v31  ;;  %v2580_v38 = vadd.s32 184, %v1705_v1  ;;  %v876_v39 = vsel %vm811_vm4, %v1758_v22, %v746_v35  ;;  %vm305_vm8 = vcmp.eq.s32.totalorder %v240_v34, %v1738_v13  ;;  %vm435_vm9 = vcmp.eq.s32.totalorder %v240_v34, %v1742_v15 }
  0xa8   : > { %vm565_vm10 = vcmp.eq.s32.totalorder %v240_v34, %v1746_v17  ;;  %v1006_v40 = vsel %vm941_vm5, %v1767_v26, %v876_v39  ;;  %v370_v10 = vsel %vm305_vm8, %v1740_v14, 0.0  ;;  %vm695_vm11 = vcmp.eq.s32.totalorder %v240_v34, %v1750_v19 }
  0xa9   : > { %vm825_vm12 = vcmp.eq.s32.totalorder %v240_v34, %v1756_v21  ;;  %v1136_v9 = vsel %vm1071_vm6, %v1773_v29, %v1006_v40  ;;  %v500_v41 = vsel %vm435_vm9, %v1744_v16, %v370_v10  ;;  %vm955_vm13 = vcmp.eq.s32.totalorder %v240_v34, %v1763_v24 }
  0xaa   : > { %vm1085_vm14 = vcmp.eq.s32.totalorder %v240_v34, %v1769_v27  ;;  %v1266_v42 = vsel %vm1201_vm7, %v1779_v32, %v1136_v9  ;;  %v630_v43 = vsel %vm565_vm10, %v1748_v18, %v500_v41  ;;  %vm1215_vm15 = vcmp.eq.s32.totalorder %v240_v34, %v1775_v30 }
  0xab   : > { %vm322_vm0 = vcmp.eq.s32.totalorder %v257_v36, %v1738_v13  ;;  %1342 = vmatpush.msra.mxu1 %v1266_v42  ;;  %v760_v44 = vsel %vm695_vm11, %v1752_v20, %v630_v43  ;;  %vm452_vm1 = vcmp.eq.s32.totalorder %v257_v36, %v1742_v15  ;;  %vm582_vm2 = vcmp.eq.s32.totalorder %v257_v36, %v1746_v17 }
  0xac   : > { %v387_v45 = vsel %vm322_vm0, %v1740_v14, 0.0  ;;  %v890_v46 = vsel %vm825_vm12, %v1758_v22, %v760_v44  ;;  %vm712_vm3 = vcmp.eq.s32.totalorder %v257_v36, %v1750_v19  ;;  %vm842_vm4 = vcmp.eq.s32.totalorder %v257_v36, %v1756_v21 }
  0xad   : > { %v517_v11 = vsel %vm452_vm1, %v1744_v16, %v387_v45  ;;  %v1020_v47 = vsel %vm955_vm13, %v1767_v26, %v890_v46  ;;  %vm972_vm5 = vcmp.eq.s32.totalorder %v257_v36, %v1763_v24  ;;  %vm1102_vm6 = vcmp.eq.s32.totalorder %v257_v36, %v1769_v27 }
  0xae   : > { %v647_v48 = vsel %vm582_vm2, %v1748_v18, %v517_v11  ;;  %v1150_v49 = vsel %vm1085_vm14, %v1773_v29, %v1020_v47  ;;  %vm1232_vm7 = vcmp.eq.s32.totalorder %v257_v36, %v1775_v30  ;;  %vm274_vm8 = vcmp.eq.s32.totalorder %v2577_v37, %v1738_v13 }
  0xaf   : > { %v777_v50 = vsel %vm712_vm3, %v1752_v20, %v647_v48  ;;  %v1280_v51 = vsel %vm1215_vm15, %v1779_v32, %v1150_v49  ;;  %v339_v53 = vsel %vm274_vm8, %v1740_v14, 0.0  ;;  %vm404_vm9 = vcmp.eq.s32.totalorder %v2577_v37, %v1742_v15 }
  0xb0   : > { %v907_v52 = vsel %vm842_vm4, %v1758_v22, %v777_v50  ;;  %1373 = vmatpush.msra.mxu2 %v1280_v51  ;;  %v469_v55 = vsel %vm404_vm9, %v1744_v16, %v339_v53  ;;  %vm534_vm10 = vcmp.eq.s32.totalorder %v2577_v37, %v1746_v17  ;;  %vm664_vm11 = vcmp.eq.s32.totalorder %v2577_v37, %v1750_v19 }
  0xb1   : > { %v1037_v54 = vsel %vm972_vm5, %v1767_v26, %v907_v52  ;;  %v599_v57 = vsel %vm534_vm10, %v1748_v18, %v469_v55  ;;  %vm794_vm12 = vcmp.eq.s32.totalorder %v2577_v37, %v1756_v21  ;;  %vm924_vm13 = vcmp.eq.s32.totalorder %v2577_v37, %v1763_v24 }
  0xb2   : > { %v1167_v56 = vsel %vm1102_vm6, %v1773_v29, %v1037_v54  ;;  %v729_v59 = vsel %vm664_vm11, %v1752_v20, %v599_v57  ;;  %vm1054_vm14 = vcmp.eq.s32.totalorder %v2577_v37, %v1769_v27  ;;  %vm1184_vm15 = vcmp.eq.s32.totalorder %v2577_v37, %v1775_v30 }
  0xb3   : > { %v1297_v58 = vsel %vm1232_vm7, %v1779_v32, %v1167_v56  ;;  %v859_v60 = vsel %vm794_vm12, %v1758_v22, %v729_v59  ;;  %vm290_vm0 = vcmp.eq.s32.totalorder %v2580_v38, %v1738_v13  ;;  %vm420_vm1 = vcmp.eq.s32.totalorder %v2580_v38, %v1742_v15 }
  0xb4   : > { %1401 = vmatpush.msra.mxu3 %v1297_v58  ;;  %vm550_vm2 = vcmp.eq.s32.totalorder %v2580_v38, %v1746_v17  ;;  %v989_v61 = vsel %vm924_vm13, %v1767_v26, %v859_v60  ;;  %v355_v62 = vsel %vm290_vm0, %v1740_v14, 0.0  ;;  %vm680_vm3 = vcmp.eq.s32.totalorder %v2580_v38, %v1750_v19 }
  0xb5   : > { %vm810_vm4 = vcmp.eq.s32.totalorder %v2580_v38, %v1756_v21  ;;  %v1119_v63 = vsel %vm1054_vm14, %v1773_v29, %v989_v61  ;;  %v485_v0 = vsel %vm420_vm1, %v1744_v16, %v355_v62  ;;  %vm940_vm5 = vcmp.eq.s32.totalorder %v2580_v38, %v1763_v24 }
  0xb6   : > { %vm1070_vm6 = vcmp.eq.s32.totalorder %v2580_v38, %v1769_v27  ;;  %v1249_v12 = vsel %vm1184_vm15, %v1779_v32, %v1119_v63  ;;  %v615_v2 = vsel %vm550_vm2, %v1748_v18, %v485_v0  ;;  %vm1200_vm7 = vcmp.eq.s32.totalorder %v2580_v38, %v1775_v30 }
  0xb7   : > { %v239_v3 = vadd.s32 296, %v1705_v1  ;;  %1314 = vmatpush.msra.mxu0 %v1249_v12  ;;  %v745_v4 = vsel %vm680_vm3, %v1752_v20, %v615_v2  ;;  %v256_v5 = vadd.s32 432, %v1705_v1  ;;  %v2675_v6 = vadd.s32 48, %v1705_v1 }
  0xb8   : > { %v2678_v7 = vadd.s32 176, %v1705_v1  ;;  %v875_v8 = vsel %vm810_vm4, %v1758_v22, %v745_v4  ;;  %v238_v56 = vadd.s32 288, %v1705_v1  ;;  %v255_v58 = vadd.s32 424, %v1705_v1 }
  0xb9   : > { %vm304_vm8 = vcmp.eq.s32.totalorder %v239_v3, %v1738_v13  ;;  %vm434_vm9 = vcmp.eq.s32.totalorder %v239_v3, %v1742_v15  ;;  %vm564_vm10 = vcmp.eq.s32.totalorder %v239_v3, %v1746_v17  ;;  %v1005_v23 = vsel %vm940_vm5, %v1767_v26, %v875_v8 }
  0xba   : > { %v369_v25 = vsel %vm304_vm8, %v1740_v14, 0.0  ;;  %vm694_vm11 = vcmp.eq.s32.totalorder %v239_v3, %v1750_v19  ;;  %vm824_vm12 = vcmp.eq.s32.totalorder %v239_v3, %v1756_v21  ;;  %v1135_v28 = vsel %vm1070_vm6, %v1773_v29, %v1005_v23 }
  0xbb   : > { %v499_v31 = vsel %vm434_vm9, %v1744_v16, %v369_v25  ;;  %vm954_vm13 = vcmp.eq.s32.totalorder %v239_v3, %v1763_v24  ;;  %vm1084_vm14 = vcmp.eq.s32.totalorder %v239_v3, %v1769_v27  ;;  %v1265_v33 = vsel %vm1200_vm7, %v1779_v32, %v1135_v28 }
  0xbc   : > { %v629_v34 = vsel %vm564_vm10, %v1748_v18, %v499_v31  ;;  %vm1214_vm15 = vcmp.eq.s32.totalorder %v239_v3, %v1775_v30  ;;  %vm321_vm0 = vcmp.eq.s32.totalorder %v256_v5, %v1738_v13  ;;  %1343 = vmatpush.msra.mxu1 %v1265_v33  ;;  %vm451_vm1 = vcmp.eq.s32.totalorder %v256_v5, %v1742_v15 }
  0xbd   : > { %v759_v35 = vsel %vm694_vm11, %v1752_v20, %v629_v34  ;;  %v386_v36 = vsel %vm321_vm0, %v1740_v14, 0.0  ;;  %vm581_vm2 = vcmp.eq.s32.totalorder %v256_v5, %v1746_v17  ;;  %vm711_vm3 = vcmp.eq.s32.totalorder %v256_v5, %v1750_v19 }
  0xbe   : > { %v889_v37 = vsel %vm824_vm12, %v1758_v22, %v759_v35  ;;  %v516_v38 = vsel %vm451_vm1, %v1744_v16, %v386_v36  ;;  %vm841_vm4 = vcmp.eq.s32.totalorder %v256_v5, %v1756_v21  ;;  %vm971_vm5 = vcmp.eq.s32.totalorder %v256_v5, %v1763_v24 }
  0xbf   : > { %v1019_v39 = vsel %vm954_vm13, %v1767_v26, %v889_v37  ;;  %v646_v40 = vsel %vm581_vm2, %v1748_v18, %v516_v38  ;;  %vm1101_vm6 = vcmp.eq.s32.totalorder %v256_v5, %v1769_v27  ;;  %vm1231_vm7 = vcmp.eq.s32.totalorder %v256_v5, %v1775_v30 }
  0xc0   : > { %v1149_v10 = vsel %vm1084_vm14, %v1773_v29, %v1019_v39  ;;  %v776_v9 = vsel %vm711_vm3, %v1752_v20, %v646_v40  ;;  %vm273_vm8 = vcmp.eq.s32.totalorder %v2675_v6, %v1738_v13  ;;  %vm403_vm9 = vcmp.eq.s32.totalorder %v2675_v6, %v1742_v15 }
  0xc1   : > { %v1279_v41 = vsel %vm1214_vm15, %v1779_v32, %v1149_v10  ;;  %v906_v42 = vsel %vm841_vm4, %v1758_v22, %v776_v9  ;;  %v338_v43 = vsel %vm273_vm8, %v1740_v14, 0.0  ;;  %vm533_vm10 = vcmp.eq.s32.totalorder %v2675_v6, %v1746_v17 }
  0xc2   : > { %1374 = vmatpush.msra.mxu2 %v1279_v41  ;;  %v1036_v44 = vsel %vm971_vm5, %v1767_v26, %v906_v42  ;;  %v468_v45 = vsel %vm403_vm9, %v1744_v16, %v338_v43  ;;  %vm663_vm11 = vcmp.eq.s32.totalorder %v2675_v6, %v1750_v19  ;;  %vm793_vm12 = vcmp.eq.s32.totalorder %v2675_v6, %v1756_v21 }
  0xc3   : > { %v1166_v46 = vsel %vm1101_vm6, %v1773_v29, %v1036_v44  ;;  %v598_v11 = vsel %vm533_vm10, %v1748_v18, %v468_v45  ;;  %vm923_vm13 = vcmp.eq.s32.totalorder %v2675_v6, %v1763_v24  ;;  %vm1053_vm14 = vcmp.eq.s32.totalorder %v2675_v6, %v1769_v27 }
  0xc4   : > { %v1296_v47 = vsel %vm1231_vm7, %v1779_v32, %v1166_v46  ;;  %v728_v48 = vsel %vm663_vm11, %v1752_v20, %v598_v11  ;;  %vm1183_vm15 = vcmp.eq.s32.totalorder %v2675_v6, %v1775_v30  ;;  %vm289_vm0 = vcmp.eq.s32.totalorder %v2678_v7, %v1738_v13 }
  0xc5   : > { %1402 = vmatpush.msra.mxu3 %v1296_v47  ;;  %v858_v49 = vsel %vm793_vm12, %v1758_v22, %v728_v48  ;;  %vm419_vm1 = vcmp.eq.s32.totalorder %v2678_v7, %v1742_v15  ;;  %vm549_vm2 = vcmp.eq.s32.totalorder %v2678_v7, %v1746_v17  ;;  %v354_v51 = vsel %vm289_vm0, %v1740_v14, 0.0 }
  0xc6   : > { %v988_v50 = vsel %vm923_vm13, %v1767_v26, %v858_v49  ;;  %vm679_vm3 = vcmp.eq.s32.totalorder %v2678_v7, %v1750_v19  ;;  %vm809_vm4 = vcmp.eq.s32.totalorder %v2678_v7, %v1756_v21  ;;  %v484_v53 = vsel %vm419_vm1, %v1744_v16, %v354_v51 }
  0xc7   : > { %v1118_v52 = vsel %vm1053_vm14, %v1773_v29, %v988_v50  ;;  %vm939_vm5 = vcmp.eq.s32.totalorder %v2678_v7, %v1763_v24  ;;  %vm1069_vm6 = vcmp.eq.s32.totalorder %v2678_v7, %v1769_v27  ;;  %v614_v55 = vsel %vm549_vm2, %v1748_v18, %v484_v53 }
  0xc8   : > { %v1248_v54 = vsel %vm1183_vm15, %v1779_v32, %v1118_v52  ;;  %vm1199_vm7 = vcmp.eq.s32.totalorder %v2678_v7, %v1775_v30  ;;  %v744_v57 = vsel %vm679_vm3, %v1752_v20, %v614_v55  ;;  %v2773_v59 = vadd.s32 40, %v1705_v1 }
  0xc9   : > { %1315 = vmatpush.msra.mxu0 %v1248_v54  ;;  %v2776_v60 = vadd.s32 168, %v1705_v1  ;;  %v874_v61 = vsel %vm809_vm4, %v1758_v22, %v744_v57  ;;  %vm303_vm8 = vcmp.eq.s32.totalorder %v238_v56, %v1738_v13  ;;  %vm433_vm9 = vcmp.eq.s32.totalorder %v238_v56, %v1742_v15 }
  0xca   : > { %vm563_vm10 = vcmp.eq.s32.totalorder %v238_v56, %v1746_v17  ;;  %v1004_v62 = vsel %vm939_vm5, %v1767_v26, %v874_v61  ;;  %v368_v63 = vsel %vm303_vm8, %v1740_v14, 0.0  ;;  %vm693_vm11 = vcmp.eq.s32.totalorder %v238_v56, %v1750_v19 }
  0xcb   : > { %vm823_vm12 = vcmp.eq.s32.totalorder %v238_v56, %v1756_v21  ;;  %v1134_v0 = vsel %vm1069_vm6, %v1773_v29, %v1004_v62  ;;  %v498_v12 = vsel %vm433_vm9, %v1744_v16, %v368_v63  ;;  %vm953_vm13 = vcmp.eq.s32.totalorder %v238_v56, %v1763_v24 }
  0xcc   : > { %vm1083_vm14 = vcmp.eq.s32.totalorder %v238_v56, %v1769_v27  ;;  %v1264_v2 = vsel %vm1199_vm7, %v1779_v32, %v1134_v0  ;;  %v628_v3 = vsel %vm563_vm10, %v1748_v18, %v498_v12  ;;  %vm1213_vm15 = vcmp.eq.s32.totalorder %v238_v56, %v1775_v30 }
  0xcd   : > { %vm320_vm0 = vcmp.eq.s32.totalorder %v255_v58, %v1738_v13  ;;  %1344 = vmatpush.msra.mxu1 %v1264_v2  ;;  %v758_v4 = vsel %vm693_vm11, %v1752_v20, %v628_v3  ;;  %vm450_vm1 = vcmp.eq.s32.totalorder %v255_v58, %v1742_v15  ;;  %vm580_vm2 = vcmp.eq.s32.totalorder %v255_v58, %v1746_v17 }
  0xce   : > { %v385_v5 = vsel %vm320_vm0, %v1740_v14, 0.0  ;;  %v888_v6 = vsel %vm823_vm12, %v1758_v22, %v758_v4  ;;  %vm710_vm3 = vcmp.eq.s32.totalorder %v255_v58, %v1750_v19  ;;  %vm840_vm4 = vcmp.eq.s32.totalorder %v255_v58, %v1756_v21 }
  0xcf   : > { %v515_v7 = vsel %vm450_vm1, %v1744_v16, %v385_v5  ;;  %v1018_v8 = vsel %vm953_vm13, %v1767_v26, %v888_v6  ;;  %vm970_vm5 = vcmp.eq.s32.totalorder %v255_v58, %v1763_v24  ;;  %vm1100_vm6 = vcmp.eq.s32.totalorder %v255_v58, %v1769_v27 }
  0xd0   : > { %v645_v23 = vsel %vm580_vm2, %v1748_v18, %v515_v7  ;;  %v1148_v25 = vsel %vm1083_vm14, %v1773_v29, %v1018_v8  ;;  %vm1230_vm7 = vcmp.eq.s32.totalorder %v255_v58, %v1775_v30  ;;  %vm272_vm8 = vcmp.eq.s32.totalorder %v2773_v59, %v1738_v13 }
  0xd1   : > { %v775_v28 = vsel %vm710_vm3, %v1752_v20, %v645_v23  ;;  %v1278_v31 = vsel %vm1213_vm15, %v1779_v32, %v1148_v25  ;;  %v337_v34 = vsel %vm272_vm8, %v1740_v14, 0.0  ;;  %vm402_vm9 = vcmp.eq.s32.totalorder %v2773_v59, %v1742_v15 }
  0xd2   : > { %v905_v33 = vsel %vm840_vm4, %v1758_v22, %v775_v28  ;;  %1375 = vmatpush.msra.mxu2 %v1278_v31  ;;  %v467_v36 = vsel %vm402_vm9, %v1744_v16, %v337_v34  ;;  %vm532_vm10 = vcmp.eq.s32.totalorder %v2773_v59, %v1746_v17  ;;  %vm662_vm11 = vcmp.eq.s32.totalorder %v2773_v59, %v1750_v19 }
  0xd3   : > { %v1035_v35 = vsel %vm970_vm5, %v1767_v26, %v905_v33  ;;  %v597_v38 = vsel %vm532_vm10, %v1748_v18, %v467_v36  ;;  %vm792_vm12 = vcmp.eq.s32.totalorder %v2773_v59, %v1756_v21  ;;  %vm922_vm13 = vcmp.eq.s32.totalorder %v2773_v59, %v1763_v24 }
  0xd4   : > { %v1165_v37 = vsel %vm1100_vm6, %v1773_v29, %v1035_v35  ;;  %v727_v40 = vsel %vm662_vm11, %v1752_v20, %v597_v38  ;;  %vm1052_vm14 = vcmp.eq.s32.totalorder %v2773_v59, %v1769_v27  ;;  %vm1182_vm15 = vcmp.eq.s32.totalorder %v2773_v59, %v1775_v30 }
  0xd5   : > { %v1295_v39 = vsel %vm1230_vm7, %v1779_v32, %v1165_v37  ;;  %v857_v10 = vsel %vm792_vm12, %v1758_v22, %v727_v40  ;;  %vm288_vm0 = vcmp.eq.s32.totalorder %v2776_v60, %v1738_v13  ;;  %vm418_vm1 = vcmp.eq.s32.totalorder %v2776_v60, %v1742_v15 }
  0xd6   : > { %1403 = vmatpush.msra.mxu3 %v1295_v39  ;;  %vm548_vm2 = vcmp.eq.s32.totalorder %v2776_v60, %v1746_v17  ;;  %v987_v9 = vsel %vm922_vm13, %v1767_v26, %v857_v10  ;;  %v353_v41 = vsel %vm288_vm0, %v1740_v14, 0.0  ;;  %vm678_vm3 = vcmp.eq.s32.totalorder %v2776_v60, %v1750_v19 }
  0xd7   : > { %vm808_vm4 = vcmp.eq.s32.totalorder %v2776_v60, %v1756_v21  ;;  %v1117_v42 = vsel %vm1052_vm14, %v1773_v29, %v987_v9  ;;  %v483_v43 = vsel %vm418_vm1, %v1744_v16, %v353_v41  ;;  %vm938_vm5 = vcmp.eq.s32.totalorder %v2776_v60, %v1763_v24 }
  0xd8   : > { %vm1068_vm6 = vcmp.eq.s32.totalorder %v2776_v60, %v1769_v27  ;;  %v1247_v44 = vsel %vm1182_vm15, %v1779_v32, %v1117_v42  ;;  %v613_v45 = vsel %vm548_vm2, %v1748_v18, %v483_v43  ;;  %vm1198_vm7 = vcmp.eq.s32.totalorder %v2776_v60, %v1775_v30 }
  0xd9   : > { %v237_v46 = vadd.s32 280, %v1705_v1  ;;  %1316 = vmatpush.msra.mxu0 %v1247_v44  ;;  %v743_v11 = vsel %vm678_vm3, %v1752_v20, %v613_v45  ;;  %v254_v47 = vadd.s32 416, %v1705_v1  ;;  %v2871_v48 = vadd.s32 32, %v1705_v1 }
  0xda   : > { %v2874_v49 = vadd.s32 160, %v1705_v1  ;;  %v873_v50 = vsel %vm808_vm4, %v1758_v22, %v743_v11  ;;  %v236_v37 = vadd.s32 272, %v1705_v1  ;;  %v253_v39 = vadd.s32 408, %v1705_v1 }
  0xdb   : > { %vm302_vm8 = vcmp.eq.s32.totalorder %v237_v46, %v1738_v13  ;;  %vm432_vm9 = vcmp.eq.s32.totalorder %v237_v46, %v1742_v15  ;;  %vm562_vm10 = vcmp.eq.s32.totalorder %v237_v46, %v1746_v17  ;;  %v1003_v51 = vsel %vm938_vm5, %v1767_v26, %v873_v50 }
  0xdc   : > { %v367_v52 = vsel %vm302_vm8, %v1740_v14, 0.0  ;;  %vm692_vm11 = vcmp.eq.s32.totalorder %v237_v46, %v1750_v19  ;;  %vm822_vm12 = vcmp.eq.s32.totalorder %v237_v46, %v1756_v21  ;;  %v1133_v53 = vsel %vm1068_vm6, %v1773_v29, %v1003_v51 }
  0xdd   : > { %v497_v54 = vsel %vm432_vm9, %v1744_v16, %v367_v52  ;;  %vm952_vm13 = vcmp.eq.s32.totalorder %v237_v46, %v1763_v24  ;;  %vm1082_vm14 = vcmp.eq.s32.totalorder %v237_v46, %v1769_v27  ;;  %v1263_v55 = vsel %vm1198_vm7, %v1779_v32, %v1133_v53 }
  0xde   : > { %v627_v56 = vsel %vm562_vm10, %v1748_v18, %v497_v54  ;;  %vm1212_vm15 = vcmp.eq.s32.totalorder %v237_v46, %v1775_v30  ;;  %vm319_vm0 = vcmp.eq.s32.totalorder %v254_v47, %v1738_v13  ;;  %1345 = vmatpush.msra.mxu1 %v1263_v55  ;;  %vm449_vm1 = vcmp.eq.s32.totalorder %v254_v47, %v1742_v15 }
  0xdf   : > { %v757_v57 = vsel %vm692_vm11, %v1752_v20, %v627_v56  ;;  %v384_v58 = vsel %vm319_vm0, %v1740_v14, 0.0  ;;  %vm579_vm2 = vcmp.eq.s32.totalorder %v254_v47, %v1746_v17  ;;  %vm709_vm3 = vcmp.eq.s32.totalorder %v254_v47, %v1750_v19 }
  0xe0   : > { %v887_v59 = vsel %vm822_vm12, %v1758_v22, %v757_v57  ;;  %v514_v60 = vsel %vm449_vm1, %v1744_v16, %v384_v58  ;;  %vm839_vm4 = vcmp.eq.s32.totalorder %v254_v47, %v1756_v21  ;;  %vm969_vm5 = vcmp.eq.s32.totalorder %v254_v47, %v1763_v24 }
  0xe1   : > { %v1017_v61 = vsel %vm952_vm13, %v1767_v26, %v887_v59  ;;  %v644_v62 = vsel %vm579_vm2, %v1748_v18, %v514_v60  ;;  %vm1099_vm6 = vcmp.eq.s32.totalorder %v254_v47, %v1769_v27  ;;  %vm1229_vm7 = vcmp.eq.s32.totalorder %v254_v47, %v1775_v30 }
  0xe2   : > { %v1147_v63 = vsel %vm1082_vm14, %v1773_v29, %v1017_v61  ;;  %v774_v0 = vsel %vm709_vm3, %v1752_v20, %v644_v62  ;;  %vm271_vm8 = vcmp.eq.s32.totalorder %v2871_v48, %v1738_v13  ;;  %vm401_vm9 = vcmp.eq.s32.totalorder %v2871_v48, %v1742_v15 }
  0xe3   : > { %v1277_v12 = vsel %vm1212_vm15, %v1779_v32, %v1147_v63  ;;  %v904_v2 = vsel %vm839_vm4, %v1758_v22, %v774_v0  ;;  %v336_v3 = vsel %vm271_vm8, %v1740_v14, 0.0  ;;  %vm531_vm10 = vcmp.eq.s32.totalorder %v2871_v48, %v1746_v17 }
  0xe4   : > { %1376 = vmatpush.msra.mxu2 %v1277_v12  ;;  %v1034_v4 = vsel %vm969_vm5, %v1767_v26, %v904_v2  ;;  %v466_v5 = vsel %vm401_vm9, %v1744_v16, %v336_v3  ;;  %vm661_vm11 = vcmp.eq.s32.totalorder %v2871_v48, %v1750_v19  ;;  %vm791_vm12 = vcmp.eq.s32.totalorder %v2871_v48, %v1756_v21 }
  0xe5   : > { %v1164_v6 = vsel %vm1099_vm6, %v1773_v29, %v1034_v4  ;;  %v596_v7 = vsel %vm531_vm10, %v1748_v18, %v466_v5  ;;  %vm921_vm13 = vcmp.eq.s32.totalorder %v2871_v48, %v1763_v24  ;;  %vm1051_vm14 = vcmp.eq.s32.totalorder %v2871_v48, %v1769_v27 }
  0xe6   : > { %v1294_v8 = vsel %vm1229_vm7, %v1779_v32, %v1164_v6  ;;  %v726_v23 = vsel %vm661_vm11, %v1752_v20, %v596_v7  ;;  %vm1181_vm15 = vcmp.eq.s32.totalorder %v2871_v48, %v1775_v30  ;;  %vm287_vm0 = vcmp.eq.s32.totalorder %v2874_v49, %v1738_v13 }
  0xe7   : > { %1404 = vmatpush.msra.mxu3 %v1294_v8  ;;  %v856_v25 = vsel %vm791_vm12, %v1758_v22, %v726_v23  ;;  %vm417_vm1 = vcmp.eq.s32.totalorder %v2874_v49, %v1742_v15  ;;  %vm547_vm2 = vcmp.eq.s32.totalorder %v2874_v49, %v1746_v17  ;;  %v352_v31 = vsel %vm287_vm0, %v1740_v14, 0.0 }
  0xe8   : > { %v986_v28 = vsel %vm921_vm13, %v1767_v26, %v856_v25  ;;  %vm677_vm3 = vcmp.eq.s32.totalorder %v2874_v49, %v1750_v19  ;;  %vm807_vm4 = vcmp.eq.s32.totalorder %v2874_v49, %v1756_v21  ;;  %v482_v34 = vsel %vm417_vm1, %v1744_v16, %v352_v31 }
  0xe9   : > { %v1116_v33 = vsel %vm1051_vm14, %v1773_v29, %v986_v28  ;;  %vm937_vm5 = vcmp.eq.s32.totalorder %v2874_v49, %v1763_v24  ;;  %vm1067_vm6 = vcmp.eq.s32.totalorder %v2874_v49, %v1769_v27  ;;  %v612_v36 = vsel %vm547_vm2, %v1748_v18, %v482_v34 }
  0xea   : > { %v1246_v35 = vsel %vm1181_vm15, %v1779_v32, %v1116_v33  ;;  %vm1197_vm7 = vcmp.eq.s32.totalorder %v2874_v49, %v1775_v30  ;;  %v742_v38 = vsel %vm677_vm3, %v1752_v20, %v612_v36  ;;  %v2969_v40 = vadd.s32 24, %v1705_v1 }
  0xeb   : > { %1317 = vmatpush.msra.mxu0 %v1246_v35  ;;  %v2972_v10 = vadd.s32 152, %v1705_v1  ;;  %v872_v9 = vsel %vm807_vm4, %v1758_v22, %v742_v38  ;;  %vm301_vm8 = vcmp.eq.s32.totalorder %v236_v37, %v1738_v13  ;;  %vm431_vm9 = vcmp.eq.s32.totalorder %v236_v37, %v1742_v15 }
  0xec   : > { %vm561_vm10 = vcmp.eq.s32.totalorder %v236_v37, %v1746_v17  ;;  %v1002_v41 = vsel %vm937_vm5, %v1767_v26, %v872_v9  ;;  %v366_v42 = vsel %vm301_vm8, %v1740_v14, 0.0  ;;  %vm691_vm11 = vcmp.eq.s32.totalorder %v236_v37, %v1750_v19 }
  0xed   : > { %vm821_vm12 = vcmp.eq.s32.totalorder %v236_v37, %v1756_v21  ;;  %v1132_v43 = vsel %vm1067_vm6, %v1773_v29, %v1002_v41  ;;  %v496_v44 = vsel %vm431_vm9, %v1744_v16, %v366_v42  ;;  %vm951_vm13 = vcmp.eq.s32.totalorder %v236_v37, %v1763_v24 }
  0xee   : > { %vm1081_vm14 = vcmp.eq.s32.totalorder %v236_v37, %v1769_v27  ;;  %v1262_v45 = vsel %vm1197_vm7, %v1779_v32, %v1132_v43  ;;  %v626_v46 = vsel %vm561_vm10, %v1748_v18, %v496_v44  ;;  %vm1211_vm15 = vcmp.eq.s32.totalorder %v236_v37, %v1775_v30 }
  0xef   : > { %vm318_vm0 = vcmp.eq.s32.totalorder %v253_v39, %v1738_v13  ;;  %1346 = vmatpush.msra.mxu1 %v1262_v45  ;;  %v756_v11 = vsel %vm691_vm11, %v1752_v20, %v626_v46  ;;  %vm448_vm1 = vcmp.eq.s32.totalorder %v253_v39, %v1742_v15  ;;  %vm578_vm2 = vcmp.eq.s32.totalorder %v253_v39, %v1746_v17 }
  0xf0   : > { %v383_v47 = vsel %vm318_vm0, %v1740_v14, 0.0  ;;  %v886_v48 = vsel %vm821_vm12, %v1758_v22, %v756_v11  ;;  %vm708_vm3 = vcmp.eq.s32.totalorder %v253_v39, %v1750_v19  ;;  %vm838_vm4 = vcmp.eq.s32.totalorder %v253_v39, %v1756_v21 }
  0xf1   : > { %v513_v49 = vsel %vm448_vm1, %v1744_v16, %v383_v47  ;;  %v1016_v50 = vsel %vm951_vm13, %v1767_v26, %v886_v48  ;;  %vm968_vm5 = vcmp.eq.s32.totalorder %v253_v39, %v1763_v24  ;;  %vm1098_vm6 = vcmp.eq.s32.totalorder %v253_v39, %v1769_v27 }
  0xf2   : > { %v643_v51 = vsel %vm578_vm2, %v1748_v18, %v513_v49  ;;  %v1146_v52 = vsel %vm1081_vm14, %v1773_v29, %v1016_v50  ;;  %vm1228_vm7 = vcmp.eq.s32.totalorder %v253_v39, %v1775_v30  ;;  %vm270_vm8 = vcmp.eq.s32.totalorder %v2969_v40, %v1738_v13 }
  0xf3   : > { %v773_v53 = vsel %vm708_vm3, %v1752_v20, %v643_v51  ;;  %v1276_v54 = vsel %vm1211_vm15, %v1779_v32, %v1146_v52  ;;  %v335_v56 = vsel %vm270_vm8, %v1740_v14, 0.0  ;;  %vm400_vm9 = vcmp.eq.s32.totalorder %v2969_v40, %v1742_v15 }
  0xf4   : > { %v903_v55 = vsel %vm838_vm4, %v1758_v22, %v773_v53  ;;  %1377 = vmatpush.msra.mxu2 %v1276_v54  ;;  %v465_v58 = vsel %vm400_vm9, %v1744_v16, %v335_v56  ;;  %vm530_vm10 = vcmp.eq.s32.totalorder %v2969_v40, %v1746_v17  ;;  %vm660_vm11 = vcmp.eq.s32.totalorder %v2969_v40, %v1750_v19 }
  0xf5   : > { %v1033_v57 = vsel %vm968_vm5, %v1767_v26, %v903_v55  ;;  %v595_v60 = vsel %vm530_vm10, %v1748_v18, %v465_v58  ;;  %vm790_vm12 = vcmp.eq.s32.totalorder %v2969_v40, %v1756_v21  ;;  %vm920_vm13 = vcmp.eq.s32.totalorder %v2969_v40, %v1763_v24 }
  0xf6   : > { %v1163_v59 = vsel %vm1098_vm6, %v1773_v29, %v1033_v57  ;;  %v725_v62 = vsel %vm660_vm11, %v1752_v20, %v595_v60  ;;  %vm1050_vm14 = vcmp.eq.s32.totalorder %v2969_v40, %v1769_v27  ;;  %vm1180_vm15 = vcmp.eq.s32.totalorder %v2969_v40, %v1775_v30 }
  0xf7   : > { %v1293_v61 = vsel %vm1228_vm7, %v1779_v32, %v1163_v59  ;;  %v855_v63 = vsel %vm790_vm12, %v1758_v22, %v725_v62  ;;  %vm286_vm0 = vcmp.eq.s32.totalorder %v2972_v10, %v1738_v13  ;;  %vm416_vm1 = vcmp.eq.s32.totalorder %v2972_v10, %v1742_v15 }
  0xf8   : > { %1405 = vmatpush.msra.mxu3 %v1293_v61  ;;  %vm546_vm2 = vcmp.eq.s32.totalorder %v2972_v10, %v1746_v17  ;;  %v985_v0 = vsel %vm920_vm13, %v1767_v26, %v855_v63  ;;  %v351_v12 = vsel %vm286_vm0, %v1740_v14, 0.0  ;;  %vm676_vm3 = vcmp.eq.s32.totalorder %v2972_v10, %v1750_v19 }
  0xf9   : > { %vm806_vm4 = vcmp.eq.s32.totalorder %v2972_v10, %v1756_v21  ;;  %v1115_v2 = vsel %vm1050_vm14, %v1773_v29, %v985_v0  ;;  %v481_v3 = vsel %vm416_vm1, %v1744_v16, %v351_v12  ;;  %vm936_vm5 = vcmp.eq.s32.totalorder %v2972_v10, %v1763_v24 }
  0xfa   : > { %vm1066_vm6 = vcmp.eq.s32.totalorder %v2972_v10, %v1769_v27  ;;  %v1245_v4 = vsel %vm1180_vm15, %v1779_v32, %v1115_v2  ;;  %v611_v5 = vsel %vm546_vm2, %v1748_v18, %v481_v3  ;;  %vm1196_vm7 = vcmp.eq.s32.totalorder %v2972_v10, %v1775_v30 }
  0xfb   : > { %v235_v6 = vadd.s32 264, %v1705_v1  ;;  %1318 = vmatpush.msra.mxu0 %v1245_v4  ;;  %v741_v7 = vsel %vm676_vm3, %v1752_v20, %v611_v5  ;;  %v252_v8 = vadd.s32 400, %v1705_v1  ;;  %v3067_v23 = vadd.s32 16, %v1705_v1 }
  0xfc   : > { %v3070_v25 = vadd.s32 144, %v1705_v1  ;;  %v871_v28 = vsel %vm806_vm4, %v1758_v22, %v741_v7  ;;  %v234_v59 = vadd.s32 256, %v1705_v1  ;;  %v251_v61 = vadd.s32 392, %v1705_v1 }
  0xfd   : > { %vm300_vm8 = vcmp.eq.s32.totalorder %v235_v6, %v1738_v13  ;;  %vm430_vm9 = vcmp.eq.s32.totalorder %v235_v6, %v1742_v15  ;;  %vm560_vm10 = vcmp.eq.s32.totalorder %v235_v6, %v1746_v17  ;;  %v1001_v31 = vsel %vm936_vm5, %v1767_v26, %v871_v28 }
  0xfe   : > { %v365_v33 = vsel %vm300_vm8, %v1740_v14, 0.0  ;;  %vm690_vm11 = vcmp.eq.s32.totalorder %v235_v6, %v1750_v19  ;;  %vm820_vm12 = vcmp.eq.s32.totalorder %v235_v6, %v1756_v21  ;;  %v1131_v34 = vsel %vm1066_vm6, %v1773_v29, %v1001_v31 }
  0xff   : > { %v495_v35 = vsel %vm430_vm9, %v1744_v16, %v365_v33  ;;  %vm950_vm13 = vcmp.eq.s32.totalorder %v235_v6, %v1763_v24  ;;  %vm1080_vm14 = vcmp.eq.s32.totalorder %v235_v6, %v1769_v27  ;;  %v1261_v36 = vsel %vm1196_vm7, %v1779_v32, %v1131_v34 }
 0x100   : > { %v625_v37 = vsel %vm560_vm10, %v1748_v18, %v495_v35  ;;  %vm1210_vm15 = vcmp.eq.s32.totalorder %v235_v6, %v1775_v30  ;;  %vm317_vm0 = vcmp.eq.s32.totalorder %v252_v8, %v1738_v13  ;;  %1347 = vmatpush.msra.mxu1 %v1261_v36  ;;  %vm447_vm1 = vcmp.eq.s32.totalorder %v252_v8, %v1742_v15  ;;  %v185_v35 = vld [vmem:[%s3425_s0 + $0x10] sm:$0xff] }
 0x101   : > { %v755_v38 = vsel %vm690_vm11, %v1752_v20, %v625_v37  ;;  %v382_v39 = vsel %vm317_vm0, %v1740_v14, 0.0  ;;  %vm577_vm2 = vcmp.eq.s32.totalorder %v252_v8, %v1746_v17  ;;  %vm707_vm3 = vcmp.eq.s32.totalorder %v252_v8, %v1750_v19 }
 0x102   : > { %v885_v40 = vsel %vm820_vm12, %v1758_v22, %v755_v38  ;;  %v512_v10 = vsel %vm447_vm1, %v1744_v16, %v382_v39  ;;  %vm837_vm4 = vcmp.eq.s32.totalorder %v252_v8, %v1756_v21  ;;  %vm967_vm5 = vcmp.eq.s32.totalorder %v252_v8, %v1763_v24 }
 0x103   : > { %v1015_v9 = vsel %vm950_vm13, %v1767_v26, %v885_v40  ;;  %v642_v41 = vsel %vm577_vm2, %v1748_v18, %v512_v10  ;;  %vm1097_vm6 = vcmp.eq.s32.totalorder %v252_v8, %v1769_v27  ;;  %vm1227_vm7 = vcmp.eq.s32.totalorder %v252_v8, %v1775_v30 }
 0x104   : > { %v1145_v42 = vsel %vm1080_vm14, %v1773_v29, %v1015_v9  ;;  %v772_v43 = vsel %vm707_vm3, %v1752_v20, %v642_v41  ;;  %vm269_vm8 = vcmp.eq.s32.totalorder %v3067_v23, %v1738_v13  ;;  %vm399_vm9 = vcmp.eq.s32.totalorder %v3067_v23, %v1742_v15 }
 0x105   : > { %v1275_v44 = vsel %vm1210_vm15, %v1779_v32, %v1145_v42  ;;  %v902_v45 = vsel %vm837_vm4, %v1758_v22, %v772_v43  ;;  %v334_v46 = vsel %vm269_vm8, %v1740_v14, 0.0  ;;  %vm529_vm10 = vcmp.eq.s32.totalorder %v3067_v23, %v1746_v17 }
 0x106   : > { %1378 = vmatpush.msra.mxu2 %v1275_v44  ;;  %v1032_v11 = vsel %vm967_vm5, %v1767_v26, %v902_v45  ;;  %v464_v47 = vsel %vm399_vm9, %v1744_v16, %v334_v46  ;;  %vm659_vm11 = vcmp.eq.s32.totalorder %v3067_v23, %v1750_v19  ;;  %vm789_vm12 = vcmp.eq.s32.totalorder %v3067_v23, %v1756_v21 }
 0x107   : > { %v1162_v48 = vsel %vm1097_vm6, %v1773_v29, %v1032_v11  ;;  %v594_v49 = vsel %vm529_vm10, %v1748_v18, %v464_v47  ;;  %vm919_vm13 = vcmp.eq.s32.totalorder %v3067_v23, %v1763_v24  ;;  %vm1049_vm14 = vcmp.eq.s32.totalorder %v3067_v23, %v1769_v27 }
 0x108   : > { %v1292_v50 = vsel %vm1227_vm7, %v1779_v32, %v1162_v48  ;;  %v724_v51 = vsel %vm659_vm11, %v1752_v20, %v594_v49  ;;  %vm1179_vm15 = vcmp.eq.s32.totalorder %v3067_v23, %v1775_v30  ;;  %vm285_vm0 = vcmp.eq.s32.totalorder %v3070_v25, %v1738_v13 }
 0x109   : > { %1406 = vmatpush.msra.mxu3 %v1292_v50  ;;  %v854_v52 = vsel %vm789_vm12, %v1758_v22, %v724_v51  ;;  %vm415_vm1 = vcmp.eq.s32.totalorder %v3070_v25, %v1742_v15  ;;  %vm545_vm2 = vcmp.eq.s32.totalorder %v3070_v25, %v1746_v17  ;;  %v350_v54 = vsel %vm285_vm0, %v1740_v14, 0.0  ;;  %v189_v50 = vld [vmem:[%s3425_s0 + $0x30] sm:$0xff] }
 0x10a   : > { %v984_v53 = vsel %vm919_vm13, %v1767_v26, %v854_v52  ;;  %vm675_vm3 = vcmp.eq.s32.totalorder %v3070_v25, %v1750_v19  ;;  %vm805_vm4 = vcmp.eq.s32.totalorder %v3070_v25, %v1756_v21  ;;  %v480_v56 = vsel %vm415_vm1, %v1744_v16, %v350_v54 }
 0x10b   : > { %v1114_v55 = vsel %vm1049_vm14, %v1773_v29, %v984_v53  ;;  %vm935_vm5 = vcmp.eq.s32.totalorder %v3070_v25, %v1763_v24  ;;  %vm1065_vm6 = vcmp.eq.s32.totalorder %v3070_v25, %v1769_v27  ;;  %v610_v58 = vsel %vm545_vm2, %v1748_v18, %v480_v56 }
 0x10c   : > { %v1244_v57 = vsel %vm1179_vm15, %v1779_v32, %v1114_v55  ;;  %vm1195_vm7 = vcmp.eq.s32.totalorder %v3070_v25, %v1775_v30  ;;  %v740_v60 = vsel %vm675_vm3, %v1752_v20, %v610_v58  ;;  %v3165_v62 = vadd.s32 8, %v1705_v1 }
 0x10d   : > { %1319 = vmatpush.msra.mxu0 %v1244_v57  ;;  %v3168_v63 = vadd.s32 136, %v1705_v1  ;;  %v870_v0 = vsel %vm805_vm4, %v1758_v22, %v740_v60  ;;  %vm299_vm8 = vcmp.eq.s32.totalorder %v234_v59, %v1738_v13  ;;  %vm429_vm9 = vcmp.eq.s32.totalorder %v234_v59, %v1742_v15 }
 0x10e   : > { %vm559_vm10 = vcmp.eq.s32.totalorder %v234_v59, %v1746_v17  ;;  %v1000_v12 = vsel %vm935_vm5, %v1767_v26, %v870_v0  ;;  %v364_v2 = vsel %vm299_vm8, %v1740_v14, 0.0  ;;  %vm689_vm11 = vcmp.eq.s32.totalorder %v234_v59, %v1750_v19 }
 0x10f   : > { %vm819_vm12 = vcmp.eq.s32.totalorder %v234_v59, %v1756_v21  ;;  %v1130_v3 = vsel %vm1065_vm6, %v1773_v29, %v1000_v12  ;;  %v494_v4 = vsel %vm429_vm9, %v1744_v16, %v364_v2  ;;  %vm949_vm13 = vcmp.eq.s32.totalorder %v234_v59, %v1763_v24 }
 0x110   : > { %vm1079_vm14 = vcmp.eq.s32.totalorder %v234_v59, %v1769_v27  ;;  %v1260_v5 = vsel %vm1195_vm7, %v1779_v32, %v1130_v3  ;;  %v624_v6 = vsel %vm559_vm10, %v1748_v18, %v494_v4  ;;  %vm1209_vm15 = vcmp.eq.s32.totalorder %v234_v59, %v1775_v30  ;;  %v193_v3 = vld [vmem:[%s3425_s0 + $0x50] sm:$0xff] }
 0x111   : > { %vm316_vm0 = vcmp.eq.s32.totalorder %v251_v61, %v1738_v13  ;;  %1348 = vmatpush.msra.mxu1 %v1260_v5  ;;  %v754_v7 = vsel %vm689_vm11, %v1752_v20, %v624_v6  ;;  %vm446_vm1 = vcmp.eq.s32.totalorder %v251_v61, %v1742_v15  ;;  %vm576_vm2 = vcmp.eq.s32.totalorder %v251_v61, %v1746_v17  ;;  %v186_v5 = vld [vmem:[%s3425_s0 + $0x18] sm:$0xff] }
 0x112   : > { %v381_v8 = vsel %vm316_vm0, %v1740_v14, 0.0  ;;  %v884_v23 = vsel %vm819_vm12, %v1758_v22, %v754_v7  ;;  %vm706_vm3 = vcmp.eq.s32.totalorder %v251_v61, %v1750_v19  ;;  %vm836_vm4 = vcmp.eq.s32.totalorder %v251_v61, %v1756_v21 }
 0x113   : > { %v511_v25 = vsel %vm446_vm1, %v1744_v16, %v381_v8  ;;  %v1014_v28 = vsel %vm949_vm13, %v1767_v26, %v884_v23  ;;  %vm966_vm5 = vcmp.eq.s32.totalorder %v251_v61, %v1763_v24  ;;  %vm1096_vm6 = vcmp.eq.s32.totalorder %v251_v61, %v1769_v27 }
 0x114   : > { %v641_v31 = vsel %vm576_vm2, %v1748_v18, %v511_v25  ;;  %v1144_v33 = vsel %vm1079_vm14, %v1773_v29, %v1014_v28  ;;  %vm1226_vm7 = vcmp.eq.s32.totalorder %v251_v61, %v1775_v30  ;;  %vm268_vm8 = vcmp.eq.s32.totalorder %v3165_v62, %v1738_v13 }
 0x115   : > { %v771_v34 = vsel %vm706_vm3, %v1752_v20, %v641_v31  ;;  %v1274_v36 = vsel %vm1209_vm15, %v1779_v32, %v1144_v33  ;;  %v333_v38 = vsel %vm268_vm8, %v1740_v14, 0.0  ;;  %vm398_vm9 = vcmp.eq.s32.totalorder %v3165_v62, %v1742_v15  ;;  %v195_v31 = vld [vmem:[%s3425_s0 + $0x60] sm:$0xff]  ;;  %v196_v33 = vld [vmem:[%s3425_s0 + $0x68] sm:$0xff] }
 0x116   : > { %v901_v37 = vsel %vm836_vm4, %v1758_v22, %v771_v34  ;;  %1379 = vmatpush.msra.mxu2 %v1274_v36  ;;  %v463_v40 = vsel %vm398_vm9, %v1744_v16, %v333_v38  ;;  %vm528_vm10 = vcmp.eq.s32.totalorder %v3165_v62, %v1746_v17  ;;  %vm658_vm11 = vcmp.eq.s32.totalorder %v3165_v62, %v1750_v19 }
 0x117   : > { %v1031_v39 = vsel %vm966_vm5, %v1767_v26, %v901_v37  ;;  %1380 = vmatmul.f32.vlgmr.msra.gmra.mxu2 %v185_v35  ;;  %v593_v9 = vsel %vm528_vm10, %v1748_v18, %v463_v40  ;;  %vm788_vm12 = vcmp.eq.s32.totalorder %v3165_v62, %v1756_v21  ;;  %vm918_vm13 = vcmp.eq.s32.totalorder %v3165_v62, %v1763_v24 }
 0x118   : > { %v1161_v10 = vsel %vm1096_vm6, %v1773_v29, %v1031_v39  ;;  %v723_v42 = vsel %vm658_vm11, %v1752_v20, %v593_v9  ;;  %vm1048_vm14 = vcmp.eq.s32.totalorder %v3165_v62, %v1769_v27  ;;  %vm1178_vm15 = vcmp.eq.s32.totalorder %v3165_v62, %v1775_v30 }
 0x119   : > { %v1291_v41 = vsel %vm1226_vm7, %v1779_v32, %v1161_v10  ;;  %v853_v43 = vsel %vm788_vm12, %v1758_v22, %v723_v42  ;;  %vm284_vm0 = vcmp.eq.s32.totalorder %v3168_v63, %v1738_v13  ;;  %vm414_vm1 = vcmp.eq.s32.totalorder %v3168_v63, %v1742_v15 }
 0x11a   : > { %1407 = vmatpush.msra.mxu3 %v1291_v41  ;;  %vm544_vm2 = vcmp.eq.s32.totalorder %v3168_v63, %v1746_v17  ;;  %v983_v44 = vsel %vm918_vm13, %v1767_v26, %v853_v43  ;;  %v349_v45 = vsel %vm284_vm0, %v1740_v14, 0.0  ;;  %vm674_vm3 = vcmp.eq.s32.totalorder %v3168_v63, %v1750_v19 }
 0x11b   : > { %v1113_v46 = vsel %vm1048_vm14, %v1773_v29, %v983_v44  ;;  %v479_v11 = vsel %vm414_vm1, %v1744_v16, %v349_v45  ;;  %vm804_vm4 = vcmp.eq.s32.totalorder %v3168_v63, %v1756_v21  ;;  %vm934_vm5 = vcmp.eq.s32.totalorder %v3168_v63, %v1763_v24 }
 0x11c   : > { %v1243_v47 = vsel %vm1178_vm15, %v1779_v32, %v1113_v46  ;;  %v609_v48 = vsel %vm544_vm2, %v1748_v18, %v479_v11  ;;  %vm1064_vm6 = vcmp.eq.s32.totalorder %v3168_v63, %v1769_v27  ;;  %v250_v49 = vadd.s32 384, %v1705_v1 }
 0x11d   : > { %1320 = vmatpush.msra.mxu0 %v1243_v47  ;;  %v739_v51 = vsel %vm674_vm3, %v1752_v20, %v609_v48  ;;  %vm1194_vm7 = vcmp.eq.s32.totalorder %v3168_v63, %v1775_v30  ;;  %vm267_vm8 = vcmp.eq.s32.totalorder %v1705_v1, %v1738_v13  ;;  %vm397_vm9 = vcmp.eq.s32.totalorder %v1705_v1, %v1742_v15 }
 0x11e   : > { %v869_v52 = vsel %vm804_vm4, %v1758_v22, %v739_v51  ;;  %vm315_vm10 = vcmp.eq.s32.totalorder %v250_v49, %v1738_v13  ;;  %vm445_vm11 = vcmp.eq.s32.totalorder %v250_v49, %v1742_v15  ;;  %vm575_vm12 = vcmp.eq.s32.totalorder %v250_v49, %v1746_v17 }
 0x11f   : > { %v999_v53 = vsel %vm934_vm5, %v1767_v26, %v869_v52  ;;  %v380_v54 = vsel %vm315_vm10, %v1740_v14, 0.0  ;;  %vm705_vm13 = vcmp.eq.s32.totalorder %v250_v49, %v1750_v19  ;;  %vm527_vm14 = vcmp.eq.s32.totalorder %v1705_v1, %v1746_v17  ;;  %1383 = vmatmul.f32.gmra.mxu2 %v189_v50 }
 0x120   : > { %v1129_v55 = vsel %vm1064_vm6, %v1773_v29, %v999_v53  ;;  %v510_v56 = vsel %vm445_vm11, %v1744_v16, %v380_v54  ;;  %vm835_vm15 = vcmp.eq.s32.totalorder %v250_v49, %v1756_v21  ;;  %vm965_vm0 = vcmp.eq.s32.totalorder %v250_v49, %v1763_v24 }
 0x121   : > { %v1259_v57 = vsel %vm1194_vm7, %v1779_v32, %v1129_v55  ;;  %v640_v58 = vsel %vm575_vm12, %v1748_v18, %v510_v56  ;;  %vm1095_vm1 = vcmp.eq.s32.totalorder %v250_v49, %v1769_v27  ;;  %v332_v59 = vsel %vm267_vm8, %v1740_v14, 0.0 }
 0x122   : > { %1349 = vmatpush.msra.mxu1 %v1259_v57  ;;  %v770_v60 = vsel %vm705_vm13, %v1752_v20, %v640_v58  ;;  %v462_v61 = vsel %vm397_vm9, %v1744_v16, %v332_v59  ;;  %vm657_vm2 = vcmp.eq.s32.totalorder %v1705_v1, %v1750_v19  ;;  %vm787_vm3 = vcmp.eq.s32.totalorder %v1705_v1, %v1756_v21 }
 0x123   : > { %v900_v62 = vsel %vm835_vm15, %v1758_v22, %v770_v60  ;;  %vm1225_vm4 = vcmp.eq.s32.totalorder %v250_v49, %v1775_v30  ;;  %v592_v63 = vsel %vm527_vm14, %v1748_v18, %v462_v61  ;;  %vm917_vm5 = vcmp.eq.s32.totalorder %v1705_v1, %v1763_v24 }
 0x124   : > { %v1030_v0 = vsel %vm965_vm0, %v1767_v26, %v900_v62  ;;  %v722_v12 = vsel %vm657_vm2, %v1752_v20, %v592_v63  ;;  %vm1047_vm6 = vcmp.eq.s32.totalorder %v1705_v1, %v1769_v27  ;;  %v218_v2 = vadd.s32 128, %v1705_v1 }
 0x125   : > { %v1160_v4 = vsel %vm1095_vm1, %v1773_v29, %v1030_v0  ;;  %v852_v6 = vsel %vm787_vm3, %v1758_v22, %v722_v12  ;;  %vm1177_vm7 = vcmp.eq.s32.totalorder %v1705_v1, %v1775_v30  ;;  %v183_v1 = vld [vmem:[%s3425_s0] sm:$0xff] }
 0x126   : > { %v1290_v7 = vsel %vm1225_vm4, %v1779_v32, %v1160_v4  ;;  %v982_v8 = vsel %vm917_vm5, %v1767_v26, %v852_v6  ;;  %vm283_vm8 = vcmp.eq.s32.totalorder %v218_v2, %v1738_v13  ;;  %vm413_vm9 = vcmp.eq.s32.totalorder %v218_v2, %v1742_v15 }
 0x127   : > { %1408 = vmatpush.msra.mxu3 %v1290_v7  ;;  %v1112_v23 = vsel %vm1047_vm6, %v1773_v29, %v982_v8  ;;  %v348_v25 = vsel %vm283_vm8, %v1740_v14, 0.0  ;;  %vm543_vm10 = vcmp.eq.s32.totalorder %v218_v2, %v1746_v17  ;;  %vm673_vm11 = vcmp.eq.s32.totalorder %v218_v2, %v1750_v19  ;;  %1386 = vmatmul.f32.gmra.mxu2 %v193_v3 }
 0x128   : > { %1409 = vmatmul.f32.vlgmr.msra.gmra.mxu3 %v186_v5  ;;  %v1242_v28 = vsel %vm1177_vm7, %v1779_v32, %v1112_v23  ;;  %v478_v13 = vsel %vm413_vm9, %v1744_v16, %v348_v25  ;;  %vm803_vm12 = vcmp.eq.s32.totalorder %v218_v2, %v1756_v21  ;;  %vm933_vm13 = vcmp.eq.s32.totalorder %v218_v2, %v1763_v24  ;;  %v197_v16 = vld [vmem:[%s3425_s0 + $0x70] sm:$0xff]  ;;  %v187_v24 = vld [vmem:[%s3425_s0 + $0x20] sm:$0xff] }
 0x129   : > { %1321 = vmatpush.msra.mxu0 %v1242_v28  ;;  %v608_v15 = vsel %vm543_vm10, %v1748_v18, %v478_v13  ;;  %vm1063_vm14 = vcmp.eq.s32.totalorder %v218_v2, %v1769_v27  ;;  %vm1193_vm15 = vcmp.eq.s32.totalorder %v218_v2, %v1775_v30  ;;  %v184_v18 = vld [vmem:[%s3425_s0 + $0x8] sm:$0xff]  ;;  %v194_v27 = vld [vmem:[%s3425_s0 + $0x58] sm:$0xff] }
 0x12a   : > { %v738_v14 = vsel %vm673_vm11, %v1752_v20, %v608_v15  ;;  %1322 = vmatmul.f32.vlgmr.msra.gmra.mxu0 %v183_v1  ;;  %v190_v20 = vld [vmem:[%s3425_s0 + $0x38] sm:$0xff]  ;;  %v192_v30 = vld [vmem:[%s3425_s0 + $0x48] sm:$0xff] }
 0x12b   : > { %v868_v17 = vsel %vm803_vm12, %v1758_v22, %v738_v14 }
 0x12c   : > { %v998_v19 = vsel %vm933_vm13, %v1767_v26, %v868_v17  ;;  %v188_v26 = vld [vmem:[%s3425_s0 + $0x28] sm:$0xff] }
 0x12d   : > { %v1128_v21 = vsel %vm1063_vm14, %v1773_v29, %v998_v19  ;;  %v191_v29 = vld [vmem:[%s3425_s0 + $0x40] sm:$0xff] }
 0x12e   : > { %v1258_v22 = vsel %vm1193_vm15, %v1779_v32, %v1128_v21  ;;  %v198_v32 = vld [vmem:[%s3425_s0 + $0x78] sm:$0xff] }
 0x12f   : > { %1350 = vmatpush.msra.mxu1 %v1258_v22  ;;  %1389 = vmatmul.f32.gmra.mxu2 %v197_v16 }
 0x130   : > { %1351 = vmatmul.f32.vlgmr.msra.gmra.mxu1 %v184_v18  ;;  %1412 = vmatmul.f32.gmra.mxu3 %v190_v20 }
 0x132   : > { %1325 = vmatmul.f32.gmra.mxu0 %v187_v24 }
 0x138   : > { %1354 = vmatmul.f32.gmra.mxu1 %v188_v26  ;;  %1415 = vmatmul.f32.gmra.mxu3 %v194_v27 }
 0x13a   : > { %1328 = vmatmul.f32.gmra.mxu0 %v191_v29 }
 0x140   : > { %1357 = vmatmul.f32.gmra.mxu1 %v192_v30  ;;  %1418 = vmatmul.f32.gmra.mxu3 %v198_v32 }
 0x142   : > { %1331 = vmatmul.f32.gmra.mxu0 %v195_v31 }
 0x148   : > { %1360 = vmatmul.f32.gmra.mxu1 %v196_v33 }
 0x19a   : > { %v1381_v35 = vpop.f32.mrf.mxu2 }
 0x1a2   : > { %v1384_v10 = vpop.f32.mrf.mxu2 }
 0x1a7   : > { %v1323_v34 = vpop.f32.mrf.mxu0 }
 0x1aa   : > { %v1387_v11 = vpop.f32.mrf.mxu2 }
 0x1ab   : > { %v1410_v36 = vpop.f32.mrf.mxu3 }
 0x1ad   : > { %v1352_v37 = vpop.f32.mrf.mxu1 }
 0x1ae   : > { %v1353_v38 = vadd.f32 %v1352_v37, %v1323_v34 }
 0x1af   : > { %v1326_v39 = vpop.f32.mrf.mxu0 }
 0x1b0   : > { %v1382_v40 = vadd.f32 %v1381_v35, %v1353_v38 }
 0x1b2   : > { %v1411_v9 = vadd.f32 %v1410_v36, %v1382_v40  ;;  %v1390_v54 = vpop.f32.mrf.mxu2 }
 0x1b3   : > { %v1413_v41 = vpop.f32.mrf.mxu3 }
 0x1b4   : > { %1422 = vst [vmem:[%s174_s30] sm:$0xff] %v1411_v9 }
 0x1b5   : > { %v1355_v42 = vpop.f32.mrf.mxu1 }
 0x1b6   : > { %v1356_v43 = vadd.f32 %v1355_v42, %v1326_v39 }
 0x1b7   : > { %v1329_v45 = vpop.f32.mrf.mxu0 }
 0x1b8   : > { %v1385_v44 = vadd.f32 %v1384_v10, %v1356_v43 }
 0x1ba   : > { %v1414_v46 = vadd.f32 %v1413_v41, %v1385_v44 }
 0x1bb   : > { %v1416_v48 = vpop.f32.mrf.mxu3 }
 0x1bc   : > { %1423 = vst [vmem:[%s174_s30 + $0x8] sm:$0xff] %v1414_v46 }
 0x1bd   : > { %v1358_v47 = vpop.f32.mrf.mxu1 }
 0x1be   : > { %v1359_v49 = vadd.f32 %v1358_v47, %v1329_v45 }
 0x1bf   : > { %v1332_v52 = vpop.f32.mrf.mxu0 }
 0x1c0   : > { %v1388_v50 = vadd.f32 %v1387_v11, %v1359_v49 }
 0x1c2   : > { %v1417_v51 = vadd.f32 %v1416_v48, %v1388_v50 }
 0x1c3   : > { %v1419_v56 = vpop.f32.mrf.mxu3 }
 0x1c4   : > { %1424 = vst [vmem:[%s174_s30 + $0x10] sm:$0xff] %v1417_v51 }
 0x1c5   : > { %v1361_v53 = vpop.f32.mrf.mxu1 }
 0x1c6   : > { %v1362_v55 = vadd.f32 %v1361_v53, %v1332_v52 }
 0x1c8   : > { %v1391_v57 = vadd.f32 %v1390_v54, %v1362_v55 }
 0x1ca   : > { %v1420_v58 = vadd.f32 %v1419_v56, %v1391_v57 }
 0x1cc   : > { %1425 = vst [vmem:[%s174_s30 + $0x18] sm:$0xff] %v1420_v58 }
 0x1cd   : > { %1595 = shalt.err (!%p1592_p3)
}
 0x1ce   : > { %s1632_s26 = smov 128   ;;  %s1633_s27 = smov 256  }
 0x1cf   : > { %s1634_s28 = smov 8  }
 0x1d0   : > { %1526 = dma.vmem_to_hbm [thread:$0]  (%p1693_p5), %s1439_s8, 512, %s1441_s9, %s1427_s16, %s1632_s26, %s1633_s27, %s1634_s28  }
 0x1d1 PF: > { %p1532_p4 = scmp.ge.s32.totalorder %s1630_s15, 2  ;;  %s1455_s29 = sand.u32 1, %s1618_s12  }
 0x1d2   : > { %s1456_s30 = scalar_lea.sflag [#allocation3], %s1455_s29 }
 0x1d3   : > { %p1529_p7 = pnand %p1532_p4, %p1697_p6 }
 0x1d5   : > { %p1530_p8 = pneg %p1529_p7 }
 0x1d7   : > { %1613 = dma.done.wait (%p1530_p8), %s1456_s30, 512  }
 0x1d8   : > { %1615 = vsyncadd (%p1530_p8), %s1456_s30, 4294966784  ;;  %p13_p9 = scmp.ge.s32.totalorder %s1680_s18, 4   ;;  %s3431_s12 = smov %s1622_s13 }
 0x1d9   : > { %s3432_s13 = smov %s1626_s14  ;;  %s3433_s14 = smov %s1691_s21 }
 0x1da   : > { %s3434_s15 = smov %s1680_s18  ;;  %15 = sbr.rel (!%p13_p9) target bundleno = 3 (0x3), region = 70 }
 0x1df   :  { %1462 = vsyncpa [#allocation3], 1 }
 0x1e0   :  { %1464 = vsyncpa [#allocation3 + $0x1], 1 }

</bundles_post_ra>
